<compile_context>
chip_gen: v7x
topology: tpu7x:2x2x1
jax: 0.10.0
libtpu: 0.0.40
codegen_flags: <defaults>
</compile_context>

<pallas_src>
import jax
import jax.numpy as jnp
from jax.experimental import pallas as pl
from jax.experimental.pallas import tpu as pltpu

H_DIM = 400          # true hidden width (matches the PyTorch module)
H_PAD = 512          # MXU-aligned padded hidden width (4x128 / 2x256)
TILE_B_MAX = 512     # max batch rows per grid step (multiple of 128)


def _discriminator_kernel(x_ref, w1_ref, b1_ref, w2_ref, b2_ref,
                          w3_ref, b3_ref, w4_ref, b4_ref, out_ref):
    x = x_ref[...]                                            # [TILE_B, 2]  f32
    w1 = w1_ref[...]                                          # [2, H_PAD]   f32

    # Layer 1 (K=2): two VPU broadcast FMAs -- no MXU pass for a K=2 contraction.
    h = x[:, 0:1] * w1[0:1, :] + x[:, 1:2] * w1[1:2, :] + b1_ref[...]
    h = jnp.maximum(h, 0.0)                                   # ReLU  [TILE_B, H_PAD] f32

    # Layers 2 & 3: bf16 x bf16 -> f32 MXU matmuls (lane/sublane aligned).
    h = jnp.dot(h.astype(jnp.bfloat16), w2_ref[...],
                preferred_element_type=jnp.float32) + b2_ref[...]
    h = jnp.maximum(h, 0.0)

    h = jnp.dot(h.astype(jnp.bfloat16), w3_ref[...],
                preferred_element_type=jnp.float32) + b3_ref[...]
    h = jnp.maximum(h, 0.0)

    # Layer 4 (N=1): VPU multiply + cross-lane (XLU) reduction instead of a
    # 1-output-lane matmul.  Sigmoid's exp/recip route to the EUP.
    z = jnp.sum(h * w4_ref[...], axis=-1, keepdims=True) + b4_ref[...]  # [TILE_B, 1]
    out_ref[...] = jax.nn.sigmoid(z).astype(out_ref.dtype)


def _pick_tile_b(batch, tile_b_max=TILE_B_MAX):
    """Batch tile: multiple of 128, as large as possible up to tile_b_max,
    but capped so batches spanning >=2 128-row tiles get >=2 grid steps
    (keeps both v7x TensorCores busy via dimension_semantics=("parallel",))."""
    n128 = -(-batch // 128)          # number of 128-row tiles needed
    if n128 <= 1:
        return 128
    tile = min(tile_b_max, (n128 // 2) * 128)
    return max(tile, 128)


def discriminator_forward(x, padded_params, *, tile_b_max=TILE_B_MAX):
    """x: [B, 2] float32 -> [B, 1] float32 (sigmoid probabilities)."""
    w1, b1, w2, b2, w3, b3, w4, b4 = padded_params
    B = x.shape[0]
    tile_b = _pick_tile_b(B, tile_b_max)
    b_pad = (-(-B // tile_b)) * tile_b
    if b_pad != B:
        x = jnp.pad(x, ((0, b_pad - B), (0, 0)))

    const2d = lambda i: (0, 0)   # resident weights/biases: same block every step

    # Advisory cost hint for the XLA scheduler.
    flops = 2 * b_pad * (2 * H_PAD + 2 * H_PAD * H_PAD + H_PAD)
    bytes_accessed = (b_pad * 2 * 4 + b_pad * 1 * 4            # x in, out
                      + (2 * H_PAD + 4 * H_PAD + 1) * 4        # w1,b1..b3,w4,b4 (f32)
                      + 2 * H_PAD * H_PAD * 2)                 # w2,w3 (bf16)
    cost = pl.CostEstimate(flops=int(flops),
                           transcendentals=int(b_pad),
                           bytes_accessed=int(bytes_accessed))

    out = pl.pallas_call(
        _discriminator_kernel,
        out_shape=jax.ShapeDtypeStruct((b_pad, 1), jnp.float32),
        grid=(b_pad // tile_b,),
        in_specs=[
            pl.BlockSpec((tile_b, 2), lambda i: (i, 0)),      # x tile
            pl.BlockSpec((2, H_PAD), const2d),                # w1 (f32)
            pl.BlockSpec((1, H_PAD), const2d),                # b1
            pl.BlockSpec((H_PAD, H_PAD), const2d),            # w2 (bf16)
            pl.BlockSpec((1, H_PAD), const2d),                # b2
            pl.BlockSpec((H_PAD, H_PAD), const2d),            # w3 (bf16)
            pl.BlockSpec((1, H_PAD), const2d),                # b3
            pl.BlockSpec((1, H_PAD), const2d),                # w4 (row layout, f32)
            pl.BlockSpec((1, 1), const2d),                    # b4
        ],
        out_specs=pl.BlockSpec((tile_b, 1), lambda i: (i, 0)),
        compiler_params=pltpu.CompilerParams(
            dimension_semantics=("parallel",),                # megacore on v7x
            vmem_limit_bytes=32 * 1024 * 1024,
        ),
        cost_estimate=cost,
    )(x, w1, b1, w2, b2, w3, b3, w4, b4)
    return out[:B]


def init_params(key):
    """Kaiming-normal weights (fan_in, gain=sqrt(2)), zero bias.

    Returned in 'math' layout: W is [in, out] so the forward is x @ W + b
    (equivalent to PyTorch's x @ W.T with W of shape [out, in]).
    """
    dims = [(2, H_DIM), (H_DIM, H_DIM), (H_DIM, H_DIM), (H_DIM, 1)]
    params = []
    keys = jax.random.split(key, len(dims))
    for k, (fan_in, fan_out) in zip(keys, dims):
        std = (2.0 / fan_in) ** 0.5
        w = std * jax.random.normal(k, (fan_in, fan_out), dtype=jnp.float32)
        b = jnp.zeros((1, fan_out), dtype=jnp.float32)
        params.append(w)
        params.append(b)
    return tuple(params)


def pad_params(params):
    """Zero-pad hidden width 400 -> 512 (exact no-op); store w2/w3 as bf16."""
    w1, b1, w2, b2, w3, b3, w4, b4 = params
    ph = H_PAD - H_DIM
    w1p = jnp.pad(w1, ((0, 0), (0, ph)))                         # [2, 512]   f32
    b1p = jnp.pad(b1, ((0, 0), (0, ph)))                         # [1, 512]   f32
    w2p = jnp.pad(w2, ((0, ph), (0, ph))).astype(jnp.bfloat16)   # [512, 512] bf16
    b2p = jnp.pad(b2, ((0, 0), (0, ph)))
    w3p = jnp.pad(w3, ((0, ph), (0, ph))).astype(jnp.bfloat16)   # [512, 512] bf16
    b3p = jnp.pad(b3, ((0, 0), (0, ph)))
    w4p = jnp.pad(w4[:, 0], (0, ph)).reshape(1, H_PAD)           # [1, 512]   f32
    b4p = b4                                                      # [1, 1]
    return (w1p, b1p, w2p, b2p, w3p, b3p, w4p, b4p)


def reference_forward(x, params):
    """Pure-JAX reference with the SAME numerics as the kernel
    (f32 layers 1/4 + sigmoid, bf16 x bf16 -> f32 dots for layers 2/3)."""
    w1, b1, w2, b2, w3, b3, w4, b4 = params
    h = jax.nn.relu(x @ w1 + b1)
    h = jax.nn.relu(jnp.dot(h.astype(jnp.bfloat16), w2.astype(jnp.bfloat16),
                            preferred_element_type=jnp.float32) + b2)
    h = jax.nn.relu(jnp.dot(h.astype(jnp.bfloat16), w3.astype(jnp.bfloat16),
                            preferred_element_type=jnp.float32) + b3)
    return jax.nn.sigmoid(h @ w4 + b4)


if __name__ == "__main__":
    key = jax.random.PRNGKey(0)
    k_param, k_x, k_x2 = jax.random.split(key, 3)

    true_params = init_params(k_param)
    padded_params = pad_params(true_params)

    # Small-batch check (single grid step).
    x = jax.random.normal(k_x, (8, 2), dtype=jnp.float32)        # batch=8, features=2
    out = jax.block_until_ready(discriminator_forward(x, padded_params))
    ref = reference_forward(x, true_params)
    assert out.shape == (8, 1)
    assert jnp.allclose(out, ref, atol=2e-3, rtol=2e-3), (
        f"small batch max abs diff {jnp.max(jnp.abs(out - ref))}")

    # Multi-tile check (exercises batch padding, tile picking, grid > 1).
    x2 = jax.random.normal(k_x2, (600, 2), dtype=jnp.float32)
    out2 = jax.block_until_ready(discriminator_forward(x2, padded_params))
    ref2 = reference_forward(x2, true_params)
    assert out2.shape == (600, 1)
    assert jnp.allclose(out2, ref2, atol=2e-3, rtol=2e-3), (
        f"large batch max abs diff {jnp.max(jnp.abs(out2 - ref2))}")

    print("KERNEL_OK")
</pallas_src>

<mosaic_0001>
module attributes {stable_mosaic.version = 11 : i64} {
  func.func @_discriminator_kernel(%arg0: i32, %arg1: memref<128x2xf32, #tpu.memory_space<vmem>>, %arg2: memref<2x512xf32, #tpu.memory_space<vmem>>, %arg3: memref<1x512xf32, #tpu.memory_space<vmem>>, %arg4: memref<512x512xbf16, #tpu.memory_space<vmem>>, %arg5: memref<1x512xf32, #tpu.memory_space<vmem>>, %arg6: memref<512x512xbf16, #tpu.memory_space<vmem>>, %arg7: memref<1x512xf32, #tpu.memory_space<vmem>>, %arg8: memref<1x512xf32, #tpu.memory_space<vmem>>, %arg9: memref<1x1xf32, #tpu.memory_space<vmem>>, %arg10: memref<128x1xf32, #tpu.memory_space<vmem>>) attributes {dimension_semantics = [#tpu.dimension_semantics<parallel>], iteration_bounds = array<i64: 1>, scalar_prefetch = 0 : i64, scratch_operands = 0 : i64, tpu.core_type = #tpu.core_type<tc>, window_params = [{transform_indices = @transform_0, window_bounds = array<i64: 128, 2>}, {pipeline_mode = #tpu.pipeline_mode<synchronous>, transform_indices = @transform_1, window_bounds = array<i64: 2, 512>}, {pipeline_mode = #tpu.pipeline_mode<synchronous>, transform_indices = @transform_2, window_bounds = array<i64: 1, 512>}, {pipeline_mode = #tpu.pipeline_mode<synchronous>, transform_indices = @transform_3, window_bounds = array<i64: 512, 512>}, {pipeline_mode = #tpu.pipeline_mode<synchronous>, transform_indices = @transform_4, window_bounds = array<i64: 1, 512>}, {pipeline_mode = #tpu.pipeline_mode<synchronous>, transform_indices = @transform_5, window_bounds = array<i64: 512, 512>}, {pipeline_mode = #tpu.pipeline_mode<synchronous>, transform_indices = @transform_6, window_bounds = array<i64: 1, 512>}, {pipeline_mode = #tpu.pipeline_mode<synchronous>, transform_indices = @transform_7, window_bounds = array<i64: 1, 512>}, {pipeline_mode = #tpu.pipeline_mode<synchronous>, transform_indices = @transform_8, window_bounds = array<i64: 1, 1>}, {transform_indices = @transform_9, window_bounds = array<i64: 128, 1>}]} {
    %c0 = arith.constant 0 : index
    %c0_0 = arith.constant 0 : index
    %0 = vector.load %arg1[%c0, %c0_0] : memref<128x2xf32, #tpu.memory_space<vmem>>, vector<128x2xf32>
    %c0_1 = arith.constant 0 : index
    %c0_2 = arith.constant 0 : index
    %1 = vector.load %arg2[%c0_1, %c0_2] : memref<2x512xf32, #tpu.memory_space<vmem>>, vector<2x512xf32>
    %2 = vector.extract_strided_slice %0 {offsets = [0, 0], sizes = [128, 1], strides = [1, 1]} : vector<128x2xf32> to vector<128x1xf32>
    %3 = vector.extract_strided_slice %1 {offsets = [0, 0], sizes = [1, 512], strides = [1, 1]} : vector<2x512xf32> to vector<1x512xf32>
    %4 = vector.broadcast %2 : vector<128x1xf32> to vector<128x512xf32>
    %5 = vector.broadcast %3 : vector<1x512xf32> to vector<128x512xf32>
    %6 = arith.mulf %4, %5 : vector<128x512xf32>
    %7 = vector.extract_strided_slice %0 {offsets = [0, 1], sizes = [128, 1], strides = [1, 1]} : vector<128x2xf32> to vector<128x1xf32>
    %8 = vector.extract_strided_slice %1 {offsets = [1, 0], sizes = [1, 512], strides = [1, 1]} : vector<2x512xf32> to vector<1x512xf32>
    %9 = vector.broadcast %7 : vector<128x1xf32> to vector<128x512xf32>
    %10 = vector.broadcast %8 : vector<1x512xf32> to vector<128x512xf32>
    %11 = arith.mulf %9, %10 : vector<128x512xf32>
    %12 = arith.addf %6, %11 : vector<128x512xf32>
    %c0_3 = arith.constant 0 : index
    %c0_4 = arith.constant 0 : index
    %13 = vector.load %arg3[%c0_3, %c0_4] : memref<1x512xf32, #tpu.memory_space<vmem>>, vector<1x512xf32>
    %14 = vector.broadcast %13 : vector<1x512xf32> to vector<128x512xf32>
    %15 = arith.addf %12, %14 : vector<128x512xf32>
    %cst = arith.constant 0.000000e+00 : f32
    %16 = vector.broadcast %cst : f32 to vector<128x512xf32>
    %17 = arith.maximumf %15, %16 : vector<128x512xf32>
    %18 = arith.truncf %17 : vector<128x512xf32> to vector<128x512xbf16>
    %c0_5 = arith.constant 0 : index
    %c0_6 = arith.constant 0 : index
    %19 = vector.load %arg4[%c0_5, %c0_6] : memref<512x512xbf16, #tpu.memory_space<vmem>>, vector<512x512xbf16>
    %cst_7 = arith.constant dense<0.000000e+00> : vector<128x512xf32>
    %20 = tpu.matmul %18, %19, %cst_7 {dimension_numbers = #tpu.dot_dimension_numbers<[1], [0], [0], [1], [0, 0, 1, 1], [], []>} : vector<128x512xbf16>, vector<512x512xbf16>, vector<128x512xf32> -> vector<128x512xf32>
    %c0_8 = arith.constant 0 : index
    %c0_9 = arith.constant 0 : index
    %21 = vector.load %arg5[%c0_8, %c0_9] : memref<1x512xf32, #tpu.memory_space<vmem>>, vector<1x512xf32>
    %22 = vector.broadcast %21 : vector<1x512xf32> to vector<128x512xf32>
    %23 = arith.addf %20, %22 : vector<128x512xf32>
    %cst_10 = arith.constant 0.000000e+00 : f32
    %24 = vector.broadcast %cst_10 : f32 to vector<128x512xf32>
    %25 = arith.maximumf %23, %24 : vector<128x512xf32>
    %26 = arith.truncf %25 : vector<128x512xf32> to vector<128x512xbf16>
    %c0_11 = arith.constant 0 : index
    %c0_12 = arith.constant 0 : index
    %27 = vector.load %arg6[%c0_11, %c0_12] : memref<512x512xbf16, #tpu.memory_space<vmem>>, vector<512x512xbf16>
    %cst_13 = arith.constant dense<0.000000e+00> : vector<128x512xf32>
    %28 = tpu.matmul %26, %27, %cst_13 {dimension_numbers = #tpu.dot_dimension_numbers<[1], [0], [0], [1], [0, 0, 1, 1], [], []>} : vector<128x512xbf16>, vector<512x512xbf16>, vector<128x512xf32> -> vector<128x512xf32>
    %c0_14 = arith.constant 0 : index
    %c0_15 = arith.constant 0 : index
    %29 = vector.load %arg7[%c0_14, %c0_15] : memref<1x512xf32, #tpu.memory_space<vmem>>, vector<1x512xf32>
    %30 = vector.broadcast %29 : vector<1x512xf32> to vector<128x512xf32>
    %31 = arith.addf %28, %30 : vector<128x512xf32>
    %cst_16 = arith.constant 0.000000e+00 : f32
    %32 = vector.broadcast %cst_16 : f32 to vector<128x512xf32>
    %33 = arith.maximumf %31, %32 : vector<128x512xf32>
    %c0_17 = arith.constant 0 : index
    %c0_18 = arith.constant 0 : index
    %34 = vector.load %arg8[%c0_17, %c0_18] : memref<1x512xf32, #tpu.memory_space<vmem>>, vector<1x512xf32>
    %35 = vector.broadcast %34 : vector<1x512xf32> to vector<128x512xf32>
    %36 = arith.mulf %33, %35 : vector<128x512xf32>
    %cst_19 = arith.constant dense<0.000000e+00> : vector<128xf32>
    %37 = vector.multi_reduction <add>, %36, %cst_19 [1] : vector<128x512xf32> to vector<128xf32>
    %38 = vector.shape_cast %37 : vector<128xf32> to vector<128x1xf32>
    %c0_20 = arith.constant 0 : index
    %c0_21 = arith.constant 0 : index
    %39 = vector.load %arg9[%c0_20, %c0_21] : memref<1x1xf32, #tpu.memory_space<vmem>>, vector<1x1xf32>
    %40 = vector.broadcast %39 : vector<1x1xf32> to vector<128x1xf32>
    %41 = arith.addf %38, %40 : vector<128x1xf32>
    %42 = arith.negf %41 : vector<128x1xf32>
    %43 = math.exp %42 : vector<128x1xf32>
    %cst_22 = arith.constant 1.000000e+00 : f32
    %44 = vector.broadcast %cst_22 : f32 to vector<128x1xf32>
    %45 = arith.addf %44, %43 : vector<128x1xf32>
    %46 = arith.divf %44, %45 : vector<128x1xf32>
    %c0_23 = arith.constant 0 : index
    %c0_24 = arith.constant 0 : index
    %47 = vector.load %arg10[%c0_23, %c0_24] : memref<128x1xf32, #tpu.memory_space<vmem>>, vector<128x1xf32>
    tpu.vector_store %arg10[%c0_23, %c0_24], %46 {strides = array<i32>} : memref<128x1xf32, #tpu.memory_space<vmem>>, vector<128x1xf32>,
    return
  }
  func.func @transform_0(%arg0: i32) -> (i32, i32) {
    %c0_i32 = arith.constant 0 : i32
    %c0_i32_0 = arith.constant 0 : i32
    return %arg0, %c0_i32 : i32, i32
  }
  func.func @transform_1(%arg0: i32) -> (i32, i32) {
    %c0_i32 = arith.constant 0 : i32
    %c0_i32_0 = arith.constant 0 : i32
    %c0_i32_1 = arith.constant 0 : i32
    return %c0_i32, %c0_i32_0 : i32, i32
  }
  func.func @transform_2(%arg0: i32) -> (i32, i32) {
    %c0_i32 = arith.constant 0 : i32
    %c0_i32_0 = arith.constant 0 : i32
    %c0_i32_1 = arith.constant 0 : i32
    return %c0_i32, %c0_i32_0 : i32, i32
  }
  func.func @transform_3(%arg0: i32) -> (i32, i32) {
    %c0_i32 = arith.constant 0 : i32
    %c0_i32_0 = arith.constant 0 : i32
    %c0_i32_1 = arith.constant 0 : i32
    return %c0_i32, %c0_i32_0 : i32, i32
  }
  func.func @transform_4(%arg0: i32) -> (i32, i32) {
    %c0_i32 = arith.constant 0 : i32
    %c0_i32_0 = arith.constant 0 : i32
    %c0_i32_1 = arith.constant 0 : i32
    return %c0_i32, %c0_i32_0 : i32, i32
  }
  func.func @transform_5(%arg0: i32) -> (i32, i32) {
    %c0_i32 = arith.constant 0 : i32
    %c0_i32_0 = arith.constant 0 : i32
    %c0_i32_1 = arith.constant 0 : i32
    return %c0_i32, %c0_i32_0 : i32, i32
  }
  func.func @transform_6(%arg0: i32) -> (i32, i32) {
    %c0_i32 = arith.constant 0 : i32
    %c0_i32_0 = arith.constant 0 : i32
    %c0_i32_1 = arith.constant 0 : i32
    return %c0_i32, %c0_i32_0 : i32, i32
  }
  func.func @transform_7(%arg0: i32) -> (i32, i32) {
    %c0_i32 = arith.constant 0 : i32
    %c0_i32_0 = arith.constant 0 : i32
    %c0_i32_1 = arith.constant 0 : i32
    return %c0_i32, %c0_i32_0 : i32, i32
  }
  func.func @transform_8(%arg0: i32) -> (i32, i32) {
    %c0_i32 = arith.constant 0 : i32
    %c0_i32_0 = arith.constant 0 : i32
    %c0_i32_1 = arith.constant 0 : i32
    return %c0_i32, %c0_i32_0 : i32, i32
  }
  func.func @transform_9(%arg0: i32) -> (i32, i32) {
    %c0_i32 = arith.constant 0 : i32
    %c0_i32_0 = arith.constant 0 : i32
    return %arg0, %c0_i32 : i32, i32
  }
}

</mosaic_0001>

<bundles_post_ra>
// kernel: tpu_custom_call.1
= control target key start
LH: loop header
LB: loop body
LE: loop exit
PB: predicated region body
PF: predicated region fallthrough
CT: control target
= control target key end

     0   :  { %s5685_s0 = inlined_call_operand.vmem [shape: f32[128,2], index: 0, kind: input, shape index: {}]   ;;  %s5686_s1 = inlined_call_operand.vmem [shape: f32[2,512], index: 1, kind: input, shape index: {}]   ;;  %s5687_s2 = inlined_call_operand.vmem [shape: f32[1,512], index: 2, kind: input, shape index: {}]   ;;  %s5688_s3 = inlined_call_operand.hbm [shape: bf16[512,512], index: 3, kind: input, shape index: {}]   ;;  %s5689_s4 = inlined_call_operand.vmem [shape: f32[1,512], index: 4, kind: input, shape index: {}]   ;;  %s5690_s5 = inlined_call_operand.hbm [shape: bf16[512,512], index: 5, kind: input, shape index: {}]   ;;  %s5691_s6 = inlined_call_operand.vmem [shape: f32[1,512], index: 6, kind: input, shape index: {}]   ;;  %s5692_s7 = inlined_call_operand.vmem [shape: f32[1,512], index: 7, kind: input, shape index: {}]   ;;  %s5693_s8 = inlined_call_operand.<no memory space> [shape: f32[1,1], index: 8, kind: input, shape index: {}]   ;;  %s5694_s9 = inlined_call_operand.vmem [shape: f32[128,1], index: 9, kind: output, shape index: {}]  }
   0x1   :  { %v14_v0 = vstv %s5693_s8 }
   0x2   :  { %15 = vst [vmem:[#allocation2] sm:$0x1] %v14_v0 }
   0x3   :  { %16 = vsyncpa [#allocation4], 0 }
   0x4   :  { %17 = vsyncpa [#allocation6], 0  ;;  %s4674_s11 = smov [#allocation3]   ;;  %s4626_s15 = scalar_lea.hbm %s5688_s3, 16384 }
   0x5   :  { %s29_s12 = sshll.u32 %s4674_s11, 4  ;;  %p4627_p0 = scmp.ne.s32.totalorder %s5688_s3, %s4626_s15  ;;  %s30_s12 = int_to_ptr.vmem [resolvable:$true] %s29_s12 }
   0x6   :  { %p4630_p1 = scmp.lt.u32.totalorder %s4626_s15, %s5688_s3 }
   0x8   :  { %p4632_p2 = pnand %p4630_p1, %p4627_p0 }
   0xa   :  { %4635 = shalt.err (!%p4632_p2)
}
   0xb   :  { %s4636_s8 = scalar_lea.vmem %s30_s12, 16384  ;;  %p4641_p4 = scmp.lt.s32.totalorder %s30_s12, %s30_s12 }
   0xc   :  { %p4637_p3 = scmp.ne.s32.totalorder %s30_s12, %s4636_s8  ;;  %p4642_p5 = scmp.lt.s32.totalorder %s4636_s8, %s4636_s8 }
   0xe   :  { %p4643_p6 = por %p4642_p5, %p4641_p4 }
  0x10   :  { %p4644_p7 = pnand %p4643_p6, %p4637_p3 }
  0x12   :  { %4647 = shalt.err (!%p4644_p7)
}
  0x13   :  { %s4675_s20 = smov 256   ;;  %s4676_s21 = smov 16  }
  0x14   :  { %35 = dma.hbm_to_vmem [thread:$0]  %s5688_s3, 16384, %s30_s12, [#allocation4], %s4675_s20, %s4675_s20, %s4676_s21  }
  0x15   :  { %s4677_s24 = smov [#allocation5]   ;;  %s4648_s28 = scalar_lea.hbm %s5690_s5, 16384 }
  0x16   :  { %s43_s25 = sshll.u32 %s4677_s24, 4  ;;  %p4649_p8 = scmp.ne.s32.totalorder %s5690_s5, %s4648_s28  ;;  %s44_s25 = int_to_ptr.vmem [resolvable:$true] %s43_s25 }
  0x17   :  { %p4652_p9 = scmp.lt.u32.totalorder %s4648_s28, %s5690_s5 }
  0x19   :  { %p4654_p10 = pnand %p4652_p9, %p4649_p8 }
  0x1b   :  { %4657 = shalt.err (!%p4654_p10)
}
  0x1c   :  { %s4658_s13 = scalar_lea.vmem %s44_s25, 16384  ;;  %p4663_p12 = scmp.lt.s32.totalorder %s44_s25, %s44_s25 }
  0x1d   :  { %p4659_p11 = scmp.ne.s32.totalorder %s44_s25, %s4658_s13  ;;  %p4664_p13 = scmp.lt.s32.totalorder %s4658_s13, %s4658_s13 }
  0x1f   :  { %p4665_p0 = por %p4664_p13, %p4663_p12 }
  0x21   :  { %p4666_p1 = pnand %p4665_p0, %p4659_p11 }
  0x23   :  { %4669 = shalt.err (!%p4666_p1)
}
  0x24   :  { %49 = dma.hbm_to_vmem [thread:$0]  %s5690_s5, 16384, %s44_s25, [#allocation6], %s4675_s20, %s4675_s20, %s4676_s21  }
  0x25   :  { %4670 = dma.done.wait [#allocation4], 16384  }
  0x26   :  { %4671 = vsyncadd [#allocation4], 4294950912 }
  0x27   :  { %4672 = dma.done.wait [#allocation6], 16384  }
  0x28   :  { %4673 = vsyncadd [#allocation6], 4294950912  ;;  %v4678_v1 = vmov 1   ;;  %v4679_v2 = vmov 0   ;;  %v62_v3 = vld [vmem:[%s5685_s0] sm:$0xff]  ;;  %v63_v4 = vld [vmem:[%s5685_s0 + $0x8] sm:$0xff]  ;;  %v160_v36 = vlaneseq }
  0x29   :  { %4158 = vset.pattern.permute.xlu1 %v4678_v1  ;;  %4157 = vset.pattern.permute.xlu0 %v4679_v2  ;;  %v64_v5 = vld [vmem:[%s5685_s0 + $0x10] sm:$0xff]  ;;  %v65_v8 = vld [vmem:[%s5685_s0 + $0x18] sm:$0xff]  ;;  %v66_v17 = vld [vmem:[%s5685_s0 + $0x20] sm:$0xff]  ;;  %vm3599_vm0 = vcmask 7168  }
  0x2a   :  { %261 = vperm.xlu1 %4158, %v62_v3   ;;  %81 = vperm.xlu0 %4157, %v62_v3   ;;  %v4178_v6 = vld [vmem:[#allocation3 + $0x4] ss:$16 sps:$4 sm:$0xff]   ;;  %v4180_v7 = vld [vmem:[#allocation3 + $0xc] ss:$16 sps:$4 sm:$0xff]   ;;  %v4182_v9 = vld [vmem:[#allocation3] ss:$16 sps:$4 sm:$0xff]  }
  0x2b   :  { %1460 = vmatprep.subr.bf16.mxu0 %v4178_v6  ;;  %v4183_v10 = vld [vmem:[#allocation3 + $0x8] ss:$16 sps:$4 sm:$0xff]   ;;  %1686 = vmatprep.subr.bf16.mxu1 %v4180_v7  ;;  %v4184_v11 = vld [vmem:[#allocation3 + $0x24] ss:$16 sps:$4 sm:$0xff]   ;;  %v4186_v12 = vld [vmem:[#allocation3 + $0x2c] ss:$16 sps:$4 sm:$0xff]  }
  0x2c   :  { %1461 = vmatpush1.bf16.msra.mxu0 %v4182_v9  ;;  %1687 = vmatpush1.bf16.msra.mxu1 %v4183_v10  ;;  %v4188_v13 = vld [vmem:[#allocation3 + $0x20] ss:$16 sps:$4 sm:$0xff]   ;;  %v4189_v14 = vld [vmem:[#allocation3 + $0x28] ss:$16 sps:$4 sm:$0xff]   ;;  %v4190_v15 = vld [vmem:[#allocation3 + $0x44] ss:$16 sps:$4 sm:$0xff]  }
  0x2d   :  { %1462 = vmatprep.subr.bf16.mxu0 %v4184_v11  ;;  %1688 = vmatprep.subr.bf16.mxu1 %v4186_v12  ;;  %v4192_v16 = vld [vmem:[#allocation3 + $0x4c] ss:$16 sps:$4 sm:$0xff]   ;;  %v4194_v19 = vld [vmem:[#allocation3 + $0x40] ss:$16 sps:$4 sm:$0xff]   ;;  %v4195_v20 = vld [vmem:[#allocation3 + $0x48] ss:$16 sps:$4 sm:$0xff]  }
  0x2e   :  { %265 = vperm.xlu1 %4158, %v63_v4   ;;  %86 = vperm.xlu0 %4157, %v63_v4   ;;  %v68_v18 = vld [vmem:[%s5685_s0 + $0x30] sm:$0xff]  ;;  %v67_v24 = vld [vmem:[%s5685_s0 + $0x28] sm:$0xff]  ;;  %v69_v38 = vld [vmem:[%s5685_s0 + $0x38] sm:$0xff]  ;;  %v4798_v43 = vshrl.u32 %v160_v36, 7 }
  0x2f   :  { %v4196_v21 = vld [vmem:[#allocation3 + $0x64] ss:$16 sps:$4 sm:$0xff]   ;;  %v4198_v22 = vld [vmem:[#allocation3 + $0x6c] ss:$16 sps:$4 sm:$0xff]   ;;  %v4200_v23 = vld [vmem:[#allocation3 + $0x60] ss:$16 sps:$4 sm:$0xff]  }
  0x30   :  { %1463 = vmatpush1.bf16.msra.mxu0 %v4188_v13  ;;  %1689 = vmatpush1.bf16.msra.mxu1 %v4189_v14  ;;  %v4201_v25 = vld [vmem:[#allocation3 + $0x68] ss:$16 sps:$4 sm:$0xff]   ;;  %v4202_v26 = vld [vmem:[#allocation3 + $0x84] ss:$16 sps:$4 sm:$0xff]   ;;  %v4204_v27 = vld [vmem:[#allocation3 + $0x8c] ss:$16 sps:$4 sm:$0xff]  }
  0x31   :  { %1464 = vmatprep.subr.bf16.mxu0 %v4190_v15  ;;  %1690 = vmatprep.subr.bf16.mxu1 %v4192_v16  ;;  %v4206_v28 = vld [vmem:[#allocation3 + $0x80] ss:$16 sps:$4 sm:$0xff]   ;;  %v4207_v29 = vld [vmem:[#allocation3 + $0x88] ss:$16 sps:$4 sm:$0xff]   ;;  %v4208_v30 = vld [vmem:[#allocation3 + $0xa4] ss:$16 sps:$4 sm:$0xff]  }
  0x32   :  { %4159 = vset.pattern.permute.xlu1 %v4679_v2  ;;  %91 = vperm.xlu0 %4157, %v64_v5   ;;  %v4210_v31 = vld [vmem:[#allocation3 + $0xac] ss:$16 sps:$4 sm:$0xff]   ;;  %v4212_v33 = vld [vmem:[#allocation3 + $0xa0] ss:$16 sps:$4 sm:$0xff]   ;;  %v4213_v34 = vld [vmem:[#allocation3 + $0xa8] ss:$16 sps:$4 sm:$0xff]  }
  0x33   :  { %96 = vperm.xlu1 %4159, %v65_v8   ;;  %v4789_v32 = vld [vmem:[%s5685_s0 + $0x48] sm:$0xff]  ;;  %v72_v39 = vld [vmem:[%s5685_s0 + $0x50] sm:$0xff]  ;;  %v334_v47 = vsub.s32 5, %v4798_v43  ;;  %v338_v49 = vsub.s32 7, %v4798_v43  ;;  %v170_v51 = vsub.s32 4, %v4798_v43  ;;  %v4809_v53 = vld [vmem:[%s5686_s1] sm:$0xff] }
  0x34   :  { %1465 = vmatpush1.bf16.msra.mxu0 %v4194_v19  ;;  %1691 = vmatpush1.bf16.msra.mxu1 %v4195_v20  ;;  %v4214_v35 = vld [vmem:[#allocation3 + $0xc4] ss:$16 sps:$4 sm:$0xff]   ;;  %v4216_v37 = vld [vmem:[#allocation3 + $0xcc] ss:$16 sps:$4 sm:$0xff]   ;;  %v4218_v40 = vld [vmem:[#allocation3 + $0xc0] ss:$16 sps:$4 sm:$0xff]  }
  0x35   :  { %1466 = vmatprep.subr.bf16.mxu0 %v4196_v21  ;;  %1692 = vmatprep.subr.bf16.mxu1 %v4198_v22  ;;  %v4219_v41 = vld [vmem:[#allocation3 + $0xc8] ss:$16 sps:$4 sm:$0xff]   ;;  %v4220_v42 = vld [vmem:[#allocation3 + $0xe4] ss:$16 sps:$4 sm:$0xff]   ;;  %v4222_v44 = vld [vmem:[#allocation3 + $0xec] ss:$16 sps:$4 sm:$0xff]   ;;  %v4817_v57 = vrot.slane %v4809_v53, %v334_v47  ;;  %v4820_v59 = vrot.slane %v4809_v53, %v338_v49  ;;  %v4828_v62 = vrot.slane %v4809_v53, %v170_v51 }
  0x36   :  { %4160 = vset.pattern.permute.xlu0 %v4678_v1  ;;  %v4224_v45 = vld [vmem:[#allocation3 + $0xe0] ss:$16 sps:$4 sm:$0xff]   ;;  %v4225_v46 = vld [vmem:[#allocation3 + $0xe8] ss:$16 sps:$4 sm:$0xff]   ;;  %v4226_v48 = vld [vmem:[#allocation3 + $0x104] ss:$16 sps:$4 sm:$0xff]  }
  0x37   :  { %4161 = vset.pattern.permute.xlu1 %v4678_v1  ;;  %269 = vperm.xlu0 %4160, %v64_v5   ;;  %v4228_v50 = vld [vmem:[#allocation3 + $0x10c] ss:$16 sps:$4 sm:$0xff]   ;;  %v4230_v52 = vld [vmem:[#allocation3 + $0x100] ss:$16 sps:$4 sm:$0xff]   ;;  %v174_v54 = vsub.s32 6, %v4798_v43  ;;  %v4864_v36 = vsub.s32 0, %v4798_v43 }
  0x38   :  { %273 = vperm.xlu1 %4161, %v65_v8   ;;  %1467 = vmatpush1.bf16.msra.mxu0 %v4200_v23  ;;  %v70_v55 = vld [vmem:[%s5685_s0 + $0x40] sm:$0xff]  ;;  %v4231_v56 = vld [vmem:[#allocation3 + $0x108] ss:$16 sps:$4 sm:$0xff]   ;;  %v76_v4 = vld [vmem:[%s5685_s0 + $0x70] sm:$0xff] }
  0x39   :  { %1693 = vmatpush1.bf16.msra.mxu1 %v4201_v25  ;;  %1468 = vmatprep.subr.bf16.mxu0 %v4202_v26  ;;  %v4232_v58 = vld [vmem:[#allocation3 + $0x124] ss:$16 sps:$4 sm:$0xff]   ;;  %v4234_v61 = vld [vmem:[#allocation3 + $0x12c] ss:$16 sps:$4 sm:$0xff]   ;;  %v4236_v63 = vld [vmem:[#allocation3 + $0x120] ss:$16 sps:$4 sm:$0xff]   ;;  %v4832_v0 = vrot.slane %v4809_v53, %v174_v54  ;;  %v4902_v47 = vrot.slane %v4828_v62, %v4864_v36 }
  0x3a   :  { %1694 = vmatprep.subr.bf16.mxu1 %v4204_v27  ;;  %v4825_v60 = vld [vmem:[%s5685_s0 + $0x68] sm:$0xff]  ;;  %v4242_v7 = vld [vmem:[#allocation3 + $0x140] ss:$16 sps:$4 sm:$0xff]   ;;  %v73_v15 = vld [vmem:[%s5685_s0 + $0x58] sm:$0xff]  ;;  %5709 = vst [vmem:[#allocation11_spill] sm:$0xff] %v4864_v36 }
  0x3b   :  { %285 = vperm.xlu0 %4160, %v68_v18   ;;  %v4237_v3 = vld [vmem:[#allocation3 + $0x128] ss:$16 sps:$4 sm:$0xff]   ;;  %v4238_v5 = vld [vmem:[#allocation3 + $0x144] ss:$16 sps:$4 sm:$0xff]   ;;  %v4240_v6 = vld [vmem:[#allocation3 + $0x14c] ss:$16 sps:$4 sm:$0xff]  }
  0x3c   :  { %4162 = vset.pattern.permute.xlu1 %v4679_v2  ;;  %1469 = vmatpush1.bf16.msra.mxu0 %v4206_v28  ;;  %v4243_v8 = vld [vmem:[#allocation3 + $0x148] ss:$16 sps:$4 sm:$0xff]   ;;  %v4244_v9 = vld [vmem:[#allocation3 + $0x164] ss:$16 sps:$4 sm:$0xff]   ;;  %v4246_v10 = vld [vmem:[#allocation3 + $0x16c] ss:$16 sps:$4 sm:$0xff]  }
  0x3d   :  { %101 = vperm.xlu1 %4162, %v66_v17   ;;  %1695 = vmatpush1.bf16.msra.mxu1 %v4207_v29  ;;  %v4248_v11 = vld [vmem:[#allocation3 + $0x160] ss:$16 sps:$4 sm:$0xff]   ;;  %v4249_v12 = vld [vmem:[#allocation3 + $0x168] ss:$16 sps:$4 sm:$0xff]   ;;  %v4250_v13 = vld [vmem:[#allocation3 + $0x184] ss:$16 sps:$4 sm:$0xff]  }
  0x3e   :  { %1470 = vmatprep.subr.bf16.mxu0 %v4208_v30  ;;  %1696 = vmatprep.subr.bf16.mxu1 %v4210_v31  ;;  %v4252_v14 = vld [vmem:[#allocation3 + $0x18c] ss:$16 sps:$4 sm:$0xff]   ;;  %v4254_v16 = vld [vmem:[#allocation3 + $0x180] ss:$16 sps:$4 sm:$0xff]   ;;  %v4261_v21 = vld [vmem:[#allocation3 + $0x1a8] ss:$16 sps:$4 sm:$0xff]  }
  0x3f   :  { %4165 = vset.pattern.permute.xlu0 %v4679_v2  ;;  %v4258_v19 = vld [vmem:[#allocation3 + $0x1ac] ss:$16 sps:$4 sm:$0xff]   ;;  %v4260_v20 = vld [vmem:[#allocation3 + $0x1a0] ss:$16 sps:$4 sm:$0xff]   ;;  %v4262_v22 = vld [vmem:[#allocation3 + $0x1c4] ss:$16 sps:$4 sm:$0xff]  }
  0x40   :  { %106 = vperm.xlu0 %4165, %v67_v24   ;;  %1471 = vmatpush1.bf16.msra.mxu0 %v4212_v33  ;;  %v4264_v23 = vld [vmem:[#allocation3 + $0x1cc] ss:$16 sps:$4 sm:$0xff]   ;;  %v4267_v25 = vld [vmem:[#allocation3 + $0x1c8] ss:$16 sps:$4 sm:$0xff]   ;;  %v4268_v27 = vld [vmem:[#allocation3 + $0x1e4] ss:$16 sps:$4 sm:$0xff]  }
  0x41   :  { %4163 = vset.pattern.permute.xlu1 %v4678_v1  ;;  %1697 = vmatpush1.bf16.msra.mxu1 %v4213_v34  ;;  %v74_v26 = vld [vmem:[%s5685_s0 + $0x60] sm:$0xff]  ;;  %v4273_v30 = vld [vmem:[#allocation3 + $0x1e8] ss:$16 sps:$4 sm:$0xff]   ;;  %v4858_v34 = vsub.s32 1, %v4798_v43 }
  0x42   :  { %277 = vperm.xlu1 %4163, %v66_v17   ;;  %1472 = vmatprep.subr.bf16.mxu0 %v4214_v35  ;;  %v4255_v17 = vld [vmem:[#allocation3 + $0x188] ss:$16 sps:$4 sm:$0xff]   ;;  %v4270_v28 = vld [vmem:[#allocation3 + $0x1ec] ss:$16 sps:$4 sm:$0xff]   ;;  %v4272_v29 = vld [vmem:[#allocation3 + $0x1e0] ss:$16 sps:$4 sm:$0xff]  }
  0x43   :  { %1698 = vmatprep.subr.bf16.mxu1 %v4216_v37  ;;  %v4276_v31 = vld [vmem:[#allocation3 + $0x204] ss:$16 sps:$4 sm:$0xff]   ;;  %5707 = vst [vmem:[#allocation9_spill] sm:$0xff] %v4858_v34  ;;  %v4861_v35 = vsub.s32 3, %v4798_v43  ;;  %v4867_v37 = vsub.s32 2, %v4798_v43  ;;  %v4888_v43 = vrot.slane %v4817_v57, %v4858_v34 }
  0x44   :  { %111 = vperm.xlu0 %4165, %v68_v18   ;;  %1473 = vmatpush1.bf16.msra.mxu0 %v4218_v40  ;;  %v4256_v18 = vld [vmem:[#allocation3 + $0x1a4] ss:$16 sps:$4 sm:$0xff]   ;;  %v488_v40 = vld [vmem:[%s5687_s2] sm:$0xf] }
  0x45   :  { %1699 = vmatpush1.bf16.msra.mxu1 %v4219_v41  ;;  %1474 = vmatprep.subr.bf16.mxu0 %v4220_v42  ;;  %v77_v33 = vld [vmem:[%s5685_s0 + $0x78] sm:$0xff]  ;;  %5708 = vst [vmem:[#allocation10_spill] sm:$0xff] %v4861_v35  ;;  %5710 = vst [vmem:[#allocation12_spill] sm:$0xff] %v4867_v37  ;;  %v4926_v62 = vrot.slane %v488_v40, %v4861_v35 }
  0x46   :  { %281 = vperm.xlu1 %4163, %v67_v24   ;;  %1700 = vmatprep.subr.bf16.mxu1 %v4222_v44  ;;  %v4266_v24 = vld [vmem:[#allocation3 + $0x1c0] ss:$16 sps:$4 sm:$0xff]   ;;  %v4892_v44 = vrot.slane %v4820_v59, %v4858_v34 }
  0x48   :  { %126 = vperm.xlu0 %4165, %v4789_v32   ;;  %1475 = vmatpush1.bf16.msra.mxu0 %v4224_v45 }
  0x49   :  { %1701 = vmatpush1.bf16.msra.mxu1 %v4225_v46  ;;  %1476 = vmatprep.subr.bf16.mxu0 %v4226_v48  ;;  %v4906_v48 = vrot.slane %v4832_v0, %v4864_v36 }
  0x4a   :  { %4164 = vset.pattern.permute.xlu1 %v4679_v2  ;;  %1702 = vmatprep.subr.bf16.mxu1 %v4228_v50  ;;  %v4909_v50 = vrot.slane %v488_v40, %v4867_v37 }
  0x4b   :  { %116 = vperm.xlu1 %4164, %v69_v38  }
  0x4c   :  { %4170 = vset.pattern.permute.xlu0 %v4678_v1  ;;  %1477 = vmatpush1.bf16.msra.mxu0 %v4230_v52 }
  0x4d   :  { %301 = vperm.xlu0 %4170, %v72_v39   ;;  %1703 = vmatpush1.bf16.msra.mxu1 %v4231_v56 }
  0x4e   :  { %1478 = vmatprep.subr.bf16.mxu0 %v4232_v58  ;;  %1704 = vmatprep.subr.bf16.mxu1 %v4234_v61  ;;  %v4923_v61 = vrot.slane %v488_v40, %v4864_v36 }
  0x4f   :  { %4166 = vset.pattern.permute.xlu1 %v4678_v1 }
  0x50   :  { %289 = vperm.xlu1 %4166, %v69_v38   ;;  %1479 = vmatpush1.bf16.msra.mxu0 %v4236_v63  ;;  %v327_v38 = vrot.slane %v4809_v53, %v4858_v34 }
  0x51   :  { %4171 = vset.pattern.permute.xlu0 %v4679_v2  ;;  %1705 = vmatpush1.bf16.msra.mxu1 %v4237_v3 }
  0x52   :  { %131 = vperm.xlu0 %4171, %v72_v39   ;;  %1480 = vmatprep.subr.bf16.mxu0 %v4238_v5  ;;  %v167_v39 = vrot.slane %v4809_v53, %v4867_v37  ;;  %v4881_v41 = vrot.slane %v327_v38, %v4858_v34  ;;  %v4325_v37 = vld [vmem:[#allocation3 + $0x308] ss:$16 sps:$4 sm:$0xff]  }
  0x53   :  { %1706 = vmatprep.subr.bf16.mxu1 %v4240_v6 }
  0x54   :  { %4167 = vset.pattern.permute.xlu1 %v4679_v2  ;;  %1481 = vmatpush1.bf16.msra.mxu0 %v4242_v7  ;;  %v4898_v46 = vrot.slane %v167_v39, %v4864_v36 }
  0x55   :  { %121 = vperm.xlu1 %4167, %v70_v55   ;;  %1707 = vmatpush1.bf16.msra.mxu1 %v4243_v8 }
  0x56   :  { %146 = vperm.xlu0 %4171, %v4825_v60   ;;  %1482 = vmatprep.subr.bf16.mxu0 %v4244_v9 }
  0x57   :  { %1708 = vmatprep.subr.bf16.mxu1 %v4246_v10 }
  0x58   :  { %1483 = vmatpush1.bf16.msra.mxu0 %v4248_v11 }
  0x59   :  { %4168 = vset.pattern.permute.xlu1 %v4678_v1  ;;  %1709 = vmatpush1.bf16.msra.mxu1 %v4249_v12 }
  0x5a   :  { %293 = vperm.xlu1 %4168, %v70_v55   ;;  %151 = vperm.xlu0 %4171, %v76_v4  }
  0x5b   :  { %1484 = vmatprep.subr.bf16.mxu0 %v4250_v13  ;;  %1710 = vmatprep.subr.bf16.mxu1 %v4252_v14 }
  0x5c   :  { %1485 = vmatpush1.bf16.msra.mxu0 %v4254_v16 }
  0x5d   :  { %1711 = vmatpush1.bf16.msra.mxu1 %v4255_v17  ;;  %1486 = vmatprep.subr.bf16.mxu0 %v4256_v18 }
  0x5e   :  { %297 = vperm.xlu1 %4168, %v4789_v32   ;;  %4176 = vset.pattern.permute.xlu0 %v4678_v1  ;;  %v4279_v32 = vld [vmem:[#allocation3 + $0x20c] ss:$16 sps:$4 sm:$0xff]  }
  0x5f   :  { %317 = vperm.xlu0 %4176, %v76_v4   ;;  %1712 = vmatprep.subr.bf16.mxu1 %v4258_v19 }
  0x60   :  { %1487 = vmatpush1.bf16.msra.mxu0 %v4260_v20 }
  0x61   :  { %1713 = vmatpush1.bf16.msra.mxu1 %v4261_v21  ;;  %1488 = vmatprep.subr.bf16.mxu0 %v4262_v22 }
  0x62   :  { %4169 = vset.pattern.permute.xlu1 %v4679_v2  ;;  %1714 = vmatprep.subr.bf16.mxu1 %v4264_v23 }
  0x63   :  { %136 = vperm.xlu1 %4169, %v73_v15  }
  0x64   :  { %1489 = vmatpush1.bf16.msra.mxu0 %v4266_v24 }
  0x65   :  { %1715 = vmatpush1.bf16.msra.mxu1 %v4267_v25  ;;  %1490 = vmatprep.subr.bf16.mxu0 %v4268_v27 }
  0x66   :  { %1716 = vmatprep.subr.bf16.mxu1 %v4270_v28 }
  0x67   :  { %4172 = vset.pattern.permute.xlu1 %v4678_v1 }
  0x68   :  { %305 = vperm.xlu1 %4172, %v73_v15   ;;  %1491 = vmatpush1.bf16.msra.mxu0 %v4272_v29 }
  0x69   :  { %1717 = vmatpush1.bf16.msra.mxu1 %v4273_v30  ;;  %1573 = vmatprep.subr.bf16.mxu0 %v4276_v31 }
  0x6a   :  { %1799 = vmatprep.subr.bf16.mxu1 %v4279_v32 }
  0x6c   :  { %4173 = vset.pattern.permute.xlu1 %v4679_v2 }
  0x6d   :  { %141 = vperm.xlu1 %4173, %v74_v26  }
  0x71   :  { %4174 = vset.pattern.permute.xlu1 %v4678_v1 }
  0x72   :  { %309 = vperm.xlu1 %4174, %v74_v26  }
  0x76   :  { %313 = vperm.xlu1 %4174, %v4825_v60   ;;  %v4920_v60 = vrot.slane %v488_v40, %v4858_v34 }
  0x7a   :  { %4175 = vset.pattern.permute.xlu1 %v4679_v2  ;;  %v331_v2 = vrot.slane %v4809_v53, %v4861_v35  ;;  %v4310_v35 = vld [vmem:[#allocation3 + $0x2c0] ss:$16 sps:$4 sm:$0xff]  }
  0x7b   :  { %156 = vperm.xlu1 %4175, %v77_v33  }
  0x7c   :  { %v4884_v42 = vrot.slane %v331_v2, %v4858_v34  ;;  %v4322_v34 = vld [vmem:[#allocation3 + $0x300] ss:$16 sps:$4 sm:$0xff]  }
  0x7f   :  { %4177 = vset.pattern.permute.xlu1 %v4678_v1  ;;  %v163_v1 = vrot.slane %v4809_v53, %v4864_v36 }
  0x80   :  { %321 = vperm.xlu1 %4177, %v77_v33  }
  0x81   :  { %v4895_v45 = vrot.slane %v163_v1, %v4864_v36 }
  0xa9   :  { %v262_v49 = vpop.permute.xlu1 %261  ;;  %v82_v51 = vpop.permute.xlu0 %81 }
  0xaa   :  { %v360_v52 = vmul.f32 %v4881_v41, %v262_v49  ;;  %v361_v53 = vmul.f32 %v4884_v42, %v262_v49  ;;  %v362_v54 = vmul.f32 %v4888_v43, %v262_v49  ;;  %v363_v55 = vmul.f32 %v4892_v44, %v262_v49 }
  0xab   :  { %v196_v56 = vmul.f32 %v4895_v45, %v82_v51  ;;  %v197_v57 = vmul.f32 %v4898_v46, %v82_v51  ;;  %v198_v58 = vmul.f32 %v4902_v47, %v82_v51  ;;  %v199_v59 = vmul.f32 %v4906_v48, %v82_v51 }
  0xad   :  { %v424_v63 = vadd.f32 %v360_v52, %v196_v56  ;;  %v426_v0 = vadd.f32 %v362_v54, %v198_v58  ;;  %v427_v3 = vadd.f32 %v363_v55, %v199_v59  ;;  %v266_v4 = vpop.permute.xlu1 %265  ;;  %v87_v5 = vpop.permute.xlu0 %86  ;;  %v425_v6 = vadd.f32 %v361_v53, %v197_v57 }
  0xae   :  { %v364_v7 = vmul.f32 %v4881_v41, %v266_v4  ;;  %v365_v8 = vmul.f32 %v4884_v42, %v266_v4  ;;  %v366_v9 = vmul.f32 %v4888_v43, %v266_v4  ;;  %v367_v10 = vmul.f32 %v4892_v44, %v266_v4 }
  0xaf   :  { %v4933_v11 = vadd.f32 %v4909_v50, %v426_v0  ;;  %v200_v12 = vmul.f32 %v4895_v45, %v87_v5  ;;  %v201_v13 = vmul.f32 %v4898_v46, %v87_v5  ;;  %v202_v14 = vmul.f32 %v4902_v47, %v87_v5 }
  0xb0   :  { %v203_v15 = vmul.f32 %v4906_v48, %v87_v5  ;;  %v4940_v16 = vadd.f32 %v4926_v62, %v427_v3  ;;  %v511_v20 = vadd.f32 %v4920_v60, %v425_v6  ;;  %v510_v25 = vadd.f32 %v4923_v61, %v424_v63 }
  0xb1   :  { %v430_v17 = vadd.f32 %v366_v9, %v202_v14  ;;  %v92_v18 = vpop.permute.xlu0 %91  ;;  %v429_v19 = vadd.f32 %v365_v8, %v201_v13  ;;  %v428_v21 = vadd.f32 %v364_v7, %v200_v12 }
  0xb2   :  { %v431_v22 = vadd.f32 %v367_v10, %v203_v15  ;;  %v97_v23 = vpop.permute.xlu1 %96  ;;  %v206_v24 = vmul.f32 %v4902_v47, %v92_v18  ;;  %v204_v28 = vmul.f32 %v4895_v45, %v92_v18  ;;  %v205_v29 = vmul.f32 %v4898_v46, %v92_v18 }
  0xb3   :  { %v4946_v26 = vadd.f32 %v4909_v50, %v430_v17  ;;  %v210_v27 = vmul.f32 %v4902_v47, %v97_v23  ;;  %v208_v30 = vmul.f32 %v4895_v45, %v97_v23  ;;  %v211_v31 = vmul.f32 %v4906_v48, %v97_v23 }
  0xb4   :  { %v207_v32 = vmul.f32 %v4906_v48, %v92_v18  ;;  %v515_v33 = vadd.f32 %v4920_v60, %v429_v19  ;;  %v209_v2 = vmul.f32 %v4898_v46, %v97_v23  ;;  %v575_v1 = vmax.f32 %v511_v20, 0.0  ;;  %v4274_v23 = vld [vmem:[#allocation3 + $0x200] ss:$16 sps:$4 sm:$0xff]  }
  0xb5   :  { %v580_v38 = vmax.f32 %v4946_v26, 0.0  ;;  %v517_v39 = vadd.f32 %v4926_v62, %v431_v22  ;;  %v514_v51 = vadd.f32 %v4923_v61, %v428_v21  ;;  %v574_v52 = vmax.f32 %v510_v25, 0.0 }
  0xb6   :  { %v270_v40 = vpop.permute.xlu0 %269  ;;  %v579_v49 = vmax.f32 %v515_v33, 0.0  ;;  %v577_v53 = vmax.f32 %v4940_v16, 0.0 }
  0xb7   :  { %v274_v54 = vpop.permute.xlu1 %273  ;;  %v368_v55 = vmul.f32 %v4881_v41, %v270_v40  ;;  %v369_v56 = vmul.f32 %v4884_v42, %v270_v40  ;;  %v370_v57 = vmul.f32 %v4888_v43, %v270_v40  ;;  %v371_v58 = vmul.f32 %v4892_v44, %v270_v40 }
  0xb8   :  { %v372_v59 = vmul.f32 %v4881_v41, %v274_v54  ;;  %v373_v63 = vmul.f32 %v4884_v42, %v274_v54  ;;  %v374_v0 = vmul.f32 %v4888_v43, %v274_v54  ;;  %v375_v3 = vmul.f32 %v4892_v44, %v274_v54 }
  0xb9   :  { %v432_v4 = vadd.f32 %v368_v55, %v204_v28  ;;  %v433_v5 = vadd.f32 %v369_v56, %v205_v29  ;;  %v4968_v6 = vadd.f32 %v370_v57, %v206_v24  ;;  %v435_v7 = vadd.f32 %v371_v58, %v207_v32  ;;  %v4277_v28 = vld [vmem:[#allocation3 + $0x208] ss:$16 sps:$4 sm:$0xff]   ;;  %v4282_v29 = vld [vmem:[#allocation3 + $0x224] ss:$16 sps:$4 sm:$0xff]   ;;  %v4280_v58 = vld [vmem:[#allocation3 + $0x220] ss:$16 sps:$4 sm:$0xff]  }
  0xba   :  { %v436_v8 = vadd.f32 %v372_v59, %v208_v30  ;;  %v437_v9 = vadd.f32 %v373_v63, %v209_v2  ;;  %v4970_v10 = vadd.f32 %v374_v0, %v210_v27  ;;  %v439_v12 = vadd.f32 %v375_v3, %v211_v31  ;;  %v286_v13 = vpop.permute.xlu0 %285  ;;  %v4283_v3 = vld [vmem:[#allocation3 + $0x228] ss:$16 sps:$4 sm:$0xff]  }
  0xbb   :  { %v639_v14 = vpack.c.bf16 %v579_v49, %v575_v1  ;;  %v578_v15 = vmax.f32 %v514_v51, 0.0  ;;  %v4973_v16 = vmul.f32 %v4881_v41, %v286_v13  ;;  %v4976_v17 = vmul.f32 %v4884_v42, %v286_v13 }
  0xbc   :  { %v102_v18 = vpop.permute.xlu1 %101  ;;  %v4979_v19 = vmul.f32 %v4888_v43, %v286_v13  ;;  %v4982_v20 = vmul.f32 %v4892_v44, %v286_v13  ;;  %v519_v21 = vadd.f32 %v4920_v60, %v433_v5  ;;  %v523_v22 = vadd.f32 %v4920_v60, %v437_v9  ;;  %v4288_v13 = vld [vmem:[#allocation3 + $0x244] ss:$16 sps:$4 sm:$0xff]  }
  0xbd   :  { %1492 = vmatprep.mubr.bf16.mxu0 %v639_v14  ;;  %1718 = vmatprep.mubr.bf16.mxu1 %v639_v14  ;;  %v638_v24 = vpack.c.bf16 %v578_v15, %v574_v52  ;;  %v212_v25 = vmul.f32 %v4895_v45, %v102_v18  ;;  %v213_v27 = vmul.f32 %v4898_v46, %v102_v18  ;;  %v581_v30 = vmax.f32 %v517_v39, 0.0  ;;  %v4285_v52 = vld [vmem:[#allocation3 + $0x22c] ss:$16 sps:$4 sm:$0xff]  }
  0xbe   :  { %v214_v31 = vmul.f32 %v4902_v47, %v102_v18  ;;  %v215_v32 = vmul.f32 %v4906_v48, %v102_v18  ;;  %v583_v33 = vmax.f32 %v519_v21, 0.0  ;;  %v587_v2 = vmax.f32 %v523_v22, 0.0 }
  0xbf   :  { %v576_v1 = vmax.f32 %v4933_v11, 0.0  ;;  %1493 = vmatmul.mubr.bf16.vlgmr.msra.gmra.mrb[0].mxu0 %v638_v24  ;;  %1719 = vmatmul.mubr.bf16.vlgmr.msra.gmra.mrb[0].mxu1 %v638_v24  ;;  %v518_v40 = vadd.f32 %v4923_v61, %v432_v4  ;;  %v522_v49 = vadd.f32 %v4923_v61, %v436_v8  ;;  %v107_v51 = vpop.permute.xlu0 %106  ;;  %v4993_v54 = vpack.c.bf16 %v581_v30, %v577_v53  ;;  %v4286_v24 = vld [vmem:[#allocation3 + $0x240] ss:$16 sps:$4 sm:$0xff]  }
  0xc0   :  { %v643_v55 = vpack.c.bf16 %v587_v2, %v583_v33  ;;  %v216_v39 = vmul.f32 %v4895_v45, %v107_v51  ;;  %v217_v56 = vmul.f32 %v4898_v46, %v107_v51  ;;  %v218_v57 = vmul.f32 %v4902_v47, %v107_v51  ;;  %1574 = vmatpush1.bf16.msra.mxu0 %v4274_v23  ;;  %v4289_v2 = vld [vmem:[#allocation3 + $0x248] ss:$16 sps:$4 sm:$0xff]  }
  0xc1   :  { %5711 = vst [vmem:[#allocation13_spill] sm:$0xff] %v4993_v54  ;;  %v278_v11 = vpop.permute.xlu1 %277  ;;  %v582_v59 = vmax.f32 %v518_v40, 0.0  ;;  %v586_v63 = vmax.f32 %v522_v49, 0.0  ;;  %v219_v0 = vmul.f32 %v4906_v48, %v107_v51  ;;  %1800 = vmatpush1.bf16.msra.mxu1 %v4277_v28  ;;  %1575 = vmatprep.subr.bf16.mxu0 %v4282_v29  ;;  %v5001_v53 = vpack.c.bf16 %v580_v38, %v576_v1  ;;  %v4294_v49 = vld [vmem:[#allocation3 + $0x264] ss:$16 sps:$4 sm:$0xff]  }
  0xc2   :  { %v376_v4 = vmul.f32 %v4881_v41, %v278_v11  ;;  %v377_v5 = vmul.f32 %v4884_v42, %v278_v11  ;;  %v378_v8 = vmul.f32 %v4888_v43, %v278_v11  ;;  %v379_v9 = vmul.f32 %v4892_v44, %v278_v11  ;;  %1502 = vmatprep.mubr.bf16.mxu0 %v643_v55  ;;  %v4292_v11 = vld [vmem:[#allocation3 + $0x260] ss:$16 sps:$4 sm:$0xff]  }
  0xc3   :  { %5712 = vst [vmem:[#allocation14_spill] sm:$0xff] %v5001_v53  ;;  %1728 = vmatprep.mubr.bf16.mxu1 %v643_v55  ;;  %v642_v14 = vpack.c.bf16 %v586_v63, %v582_v59  ;;  %v112_v15 = vpop.permute.xlu0 %111  ;;  %1801 = vmatprep.subr.bf16.mxu1 %v4285_v52  ;;  %v5008_v18 = vadd.f32 %v4926_v62, %v435_v7  ;;  %v4297_v59 = vld [vmem:[#allocation3 + $0x26c] ss:$16 sps:$4 sm:$0xff]  }
  0xc4   :  { %v5011_v26 = vadd.f32 %v4926_v62, %v439_v12  ;;  %v440_v38 = vadd.f32 %v376_v4, %v212_v25  ;;  %v441_v21 = vadd.f32 %v377_v5, %v213_v27  ;;  %v5013_v22 = vadd.f32 %v378_v8, %v214_v31  ;;  %1576 = vmatpush1.bf16.msra.mxu0 %v4280_v58  ;;  %v4291_v12 = vld [vmem:[#allocation3 + $0x24c] ss:$16 sps:$4 sm:$0xff]   ;;  %v4300_v5 = vld [vmem:[#allocation3 + $0x284] ss:$16 sps:$4 sm:$0xff]  }
  0xc5   :  { %v5015_v23 = vadd.f32 %v379_v9, %v215_v32  ;;  %v282_v28 = vpop.permute.xlu1 %281  ;;  %v220_v29 = vmul.f32 %v4895_v45, %v112_v15  ;;  %v221_v30 = vmul.f32 %v4898_v46, %v112_v15  ;;  %v222_v33 = vmul.f32 %v4902_v47, %v112_v15  ;;  %1802 = vmatpush1.bf16.msra.mxu1 %v4283_v3 }
  0xc6   :  { %v223_v7 = vmul.f32 %v4906_v48, %v112_v15  ;;  %v380_v25 = vmul.f32 %v4881_v41, %v282_v28  ;;  %v381_v27 = vmul.f32 %v4884_v42, %v282_v28  ;;  %v382_v31 = vmul.f32 %v4888_v43, %v282_v28  ;;  %1577 = vmatprep.subr.bf16.mxu0 %v4288_v13  ;;  %v4303_v13 = vld [vmem:[#allocation3 + $0x28c] ss:$16 sps:$4 sm:$0xff]  }
  0xc7   :  { %v383_v32 = vmul.f32 %v4892_v44, %v282_v28  ;;  %1503 = vmatmul.mubr.bf16.gmra.mrb[4].mxu0 %v642_v14  ;;  %1729 = vmatmul.mubr.bf16.gmra.mrb[4].mxu1 %v642_v14  ;;  %v5026_v1 = vadd.f32 %v4979_v19, %v222_v33  ;;  %v5028_v40 = vpop.permute.xlu0 %126  ;;  %v449_v63 = vadd.f32 %v4976_v17, %v221_v30  ;;  %v4295_v17 = vld [vmem:[#allocation3 + $0x268] ss:$16 sps:$4 sm:$0xff]   ;;  %v585_v14 = vmax.f32 %v5008_v18, 0.0 }
  0xc8   :  { %v444_v51 = vadd.f32 %v380_v25, %v216_v39  ;;  %v445_v52 = vadd.f32 %v381_v27, %v217_v56  ;;  %v5030_v55 = vadd.f32 %v382_v31, %v218_v57  ;;  %1578 = vmatpush1.bf16.msra.mxu0 %v4286_v24  ;;  %v5036_v3 = vadd.f32 %v4982_v20, %v223_v7 }
  0xc9   :  { %v5032_v58 = vadd.f32 %v383_v32, %v219_v0  ;;  %v527_v19 = vadd.f32 %v4920_v60, %v441_v21  ;;  %v526_v4 = vadd.f32 %v4923_v61, %v440_v38  ;;  %1803 = vmatprep.subr.bf16.mxu1 %v4291_v12  ;;  %v448_v56 = vadd.f32 %v4973_v16, %v220_v29 }
  0xca   :  { %v117_v39 = vpop.permute.xlu1 %116  ;;  %v531_v57 = vadd.f32 %v4920_v60, %v445_v52  ;;  %v530_v0 = vadd.f32 %v4923_v61, %v444_v51  ;;  %v5045_v8 = vmul.f32 %v4902_v47, %v5028_v40  ;;  %1804 = vmatpush1.bf16.msra.mxu1 %v4289_v2  ;;  %1579 = vmatprep.subr.bf16.mxu0 %v4294_v49  ;;  %v4298_v49 = vld [vmem:[#allocation3 + $0x280] ss:$16 sps:$4 sm:$0xff]   ;;  %v589_v51 = vmax.f32 %v5011_v26, 0.0 }
  0xcb   :  { %v226_v20 = vmul.f32 %v4902_v47, %v117_v39  ;;  %v227_v9 = vmul.f32 %v4906_v48, %v117_v39  ;;  %v591_v15 = vmax.f32 %v527_v19, 0.0  ;;  %v590_v38 = vmax.f32 %v526_v4, 0.0  ;;  %1805 = vmatprep.subr.bf16.mxu1 %v4297_v59  ;;  %v4301_v19 = vld [vmem:[#allocation3 + $0x288] ss:$16 sps:$4 sm:$0xff]   ;;  %v4306_v4 = vld [vmem:[#allocation3 + $0x2a4] ss:$16 sps:$4 sm:$0xff]  }
  0xcc   :  { %v595_v16 = vmax.f32 %v531_v57, 0.0  ;;  %v594_v21 = vmax.f32 %v530_v0, 0.0  ;;  %1580 = vmatpush1.bf16.msra.mxu0 %v4292_v11  ;;  %v302_v24 = vpop.permute.xlu0 %301  ;;  %v224_v28 = vmul.f32 %v4895_v45, %v117_v39  ;;  %v225_v29 = vmul.f32 %v4898_v46, %v117_v39  ;;  %v4309_v39 = vld [vmem:[#allocation3 + $0x2ac] ss:$16 sps:$4 sm:$0xff]  }
  0xcd   :  { %v5054_v30 = vmul.f32 %v4906_v48, %v5028_v40  ;;  %v5057_v33 = vadd.f32 %v4920_v60, %v449_v63  ;;  %1581 = vmatprep.subr.bf16.mxu0 %v4300_v5  ;;  %v534_v12 = vadd.f32 %v4923_v61, %v448_v56  ;;  %v402_v25 = vmul.f32 %v4888_v43, %v302_v24 }
  0xce   :  { %v647_v18 = vpack.c.bf16 %v595_v16, %v591_v15  ;;  %v646_v7 = vpack.c.bf16 %v594_v21, %v590_v38  ;;  %1806 = vmatpush1.bf16.msra.mxu1 %v4295_v17  ;;  %v400_v31 = vmul.f32 %v4881_v41, %v302_v24  ;;  %v401_v32 = vmul.f32 %v4884_v42, %v302_v24 }
  0xcf   :  { %v290_v27 = vpop.permute.xlu1 %289  ;;  %v403_v2 = vmul.f32 %v4892_v44, %v302_v24  ;;  %1807 = vmatprep.subr.bf16.mxu1 %v4303_v13  ;;  %v5069_v56 = vpack.c.bf16 %v589_v51, %v585_v14  ;;  %v520_v26 = vadd.f32 %v4909_v50, %v4968_v6  ;;  %v524_v57 = vadd.f32 %v4909_v50, %v4970_v10  ;;  %v4304_v6 = vld [vmem:[#allocation3 + $0x2a0] ss:$16 sps:$4 sm:$0xff]  }
  0xd0   :  { %v388_v52 = vmul.f32 %v4881_v41, %v290_v27  ;;  %v389_v11 = vmul.f32 %v4884_v42, %v290_v27  ;;  %v390_v59 = vmul.f32 %v4888_v43, %v290_v27  ;;  %v391_v63 = vmul.f32 %v4892_v44, %v290_v27  ;;  %1512 = vmatprep.mubr.bf16.mxu0 %v647_v18  ;;  %v4312_v27 = vld [vmem:[#allocation3 + $0x2c4] ss:$16 sps:$4 sm:$0xff]  }
  0xd1   :  { %1738 = vmatprep.mubr.bf16.mxu1 %v647_v18  ;;  %1513 = vmatmul.mubr.bf16.gmra.mrb[8].mxu0 %v646_v7  ;;  %v132_v5 = vpop.permute.xlu0 %131  ;;  %5713 = vst [vmem:[#allocation15_spill] sm:$0xff] %v5069_v56  ;;  %v599_v16 = vmax.f32 %v5057_v33, 0.0  ;;  %v584_v51 = vmax.f32 %v520_v26, 0.0 }
  0xd2   :  { %v452_v0 = vadd.f32 %v388_v52, %v224_v28  ;;  %v453_v17 = vadd.f32 %v389_v11, %v225_v29  ;;  %v5075_v13 = vadd.f32 %v390_v59, %v226_v20  ;;  %v5077_v15 = vadd.f32 %v391_v63, %v227_v9  ;;  %1739 = vmatmul.mubr.bf16.gmra.mrb[8].mxu1 %v646_v7  ;;  %v4307_v29 = vld [vmem:[#allocation3 + $0x2a8] ss:$16 sps:$4 sm:$0xff]  }
  0xd3   :  { %1582 = vmatpush1.bf16.msra.mxu0 %v4298_v49  ;;  %v236_v38 = vmul.f32 %v4895_v45, %v132_v5  ;;  %v238_v14 = vmul.f32 %v4902_v47, %v132_v5  ;;  %v239_v21 = vmul.f32 %v4906_v48, %v132_v5  ;;  %v598_v20 = vmax.f32 %v534_v12, 0.0  ;;  %1808 = vmatpush1.bf16.msra.mxu1 %v4301_v19  ;;  %v4315_v49 = vld [vmem:[#allocation3 + $0x2cc] ss:$16 sps:$4 sm:$0xff]  }
  0xd4   :  { %v122_v24 = vpop.permute.xlu1 %121  ;;  %v539_v10 = vadd.f32 %v4920_v60, %v453_v17  ;;  %v538_v28 = vadd.f32 %v4923_v61, %v452_v0  ;;  %v237_v9 = vmul.f32 %v4898_v46, %v132_v5  ;;  %1583 = vmatprep.subr.bf16.mxu0 %v4306_v4  ;;  %1809 = vmatprep.subr.bf16.mxu1 %v4309_v39  ;;  %v588_v52 = vmax.f32 %v524_v57, 0.0 }
  0xd5   :  { %v230_v33 = vmul.f32 %v4902_v47, %v122_v24  ;;  %v231_v18 = vmul.f32 %v4906_v48, %v122_v24  ;;  %v147_v7 = vpop.permute.xlu0 %146  ;;  %v232_v11 = vmul.f32 %v4895_v45, %v5028_v40  ;;  %v233_v12 = vmul.f32 %v4898_v46, %v5028_v40 }
  0xd6   :  { %v603_v59 = vmax.f32 %v539_v10, 0.0  ;;  %v602_v63 = vmax.f32 %v538_v28, 0.0  ;;  %v228_v19 = vmul.f32 %v4895_v45, %v122_v24  ;;  %v229_v4 = vmul.f32 %v4898_v46, %v122_v24 }
  0xd7   :  { %v5094_v5 = vadd.f32 %v402_v25, %v238_v14  ;;  %v5096_v39 = vadd.f32 %v403_v2, %v239_v21  ;;  %1584 = vmatpush1.bf16.msra.mxu0 %v4304_v6  ;;  %v5098_v57 = vadd.f32 %v400_v31, %v236_v38  ;;  %v5101_v17 = vmul.f32 %v4902_v47, %v147_v7  ;;  %v4313_v25 = vld [vmem:[#allocation3 + $0x2c8] ss:$16 sps:$4 sm:$0xff]  }
  0xd8   :  { %v651_v0 = vpack.c.bf16 %v603_v59, %v599_v16  ;;  %v650_v26 = vpack.c.bf16 %v602_v63, %v598_v20  ;;  %1810 = vmatpush1.bf16.msra.mxu1 %v4307_v29  ;;  %v465_v10 = vadd.f32 %v401_v32, %v237_v9  ;;  %v5104_v28 = vmul.f32 %v4895_v45, %v147_v7  ;;  %v4318_v32 = vld [vmem:[#allocation3 + $0x2e4] ss:$16 sps:$4 sm:$0xff]   ;;  %v4321_v9 = vld [vmem:[#allocation3 + $0x2ec] ss:$16 sps:$4 sm:$0xff]   ;;  %v4316_v59 = vld [vmem:[#allocation3 + $0x2e0] ss:$16 sps:$4 sm:$0xff]  }
  0xd9   :  { %v294_v40 = vpop.permute.xlu1 %293  ;;  %1585 = vmatprep.subr.bf16.mxu0 %v4312_v27  ;;  %1811 = vmatprep.subr.bf16.mxu1 %v4315_v49  ;;  %v152_v2 = vpop.permute.xlu0 %151  ;;  %v5106_v14 = vpack.c.bf16 %v588_v52, %v584_v51  ;;  %v5113_v6 = vmul.f32 %v4898_v46, %v147_v7  ;;  %v5116_v24 = vmul.f32 %v4906_v48, %v147_v7  ;;  %v4319_v63 = vld [vmem:[#allocation3 + $0x2e8] ss:$16 sps:$4 sm:$0xff]  }
  0xda   :  { %v392_v16 = vmul.f32 %v4881_v41, %v294_v40  ;;  %v393_v31 = vmul.f32 %v4884_v42, %v294_v40  ;;  %v394_v38 = vmul.f32 %v4888_v43, %v294_v40  ;;  %v395_v21 = vmul.f32 %v4892_v44, %v294_v40  ;;  %1522 = vmatprep.mubr.bf16.mxu0 %v651_v0  ;;  %v4324_v40 = vld [vmem:[#allocation3 + $0x304] ss:$16 sps:$4 sm:$0xff]  }
  0xdb   :  { %5714 = vst [vmem:[#allocation16_spill] sm:$0xff] %v5106_v14  ;;  %1748 = vmatprep.mubr.bf16.mxu1 %v651_v0  ;;  %1523 = vmatmul.mubr.bf16.gmra.mrb[12].mxu0 %v650_v26  ;;  %v254_v20 = vmul.f32 %v4902_v47, %v152_v2  ;;  %v5124_v0 = vadd.f32 %v4920_v60, %v465_v10 }
  0xdc   :  { %v456_v29 = vadd.f32 %v392_v16, %v228_v19  ;;  %v457_v27 = vadd.f32 %v393_v31, %v229_v4  ;;  %v5119_v49 = vadd.f32 %v394_v38, %v230_v33  ;;  %v5121_v51 = vadd.f32 %v395_v21, %v231_v18  ;;  %1749 = vmatmul.mubr.bf16.gmra.mrb[12].mxu1 %v650_v26 }
  0xdd   :  { %v298_v52 = vpop.permute.xlu1 %297  ;;  %1586 = vmatpush1.bf16.msra.mxu0 %v4310_v35  ;;  %1812 = vmatpush1.bf16.msra.mxu1 %v4313_v25  ;;  %v529_v7 = vadd.f32 %v4926_v62, %v5015_v23  ;;  %v533_v19 = vadd.f32 %v4926_v62, %v5032_v58  ;;  %v253_v23 = vmul.f32 %v4898_v46, %v152_v2  ;;  %v4327_v58 = vld [vmem:[#allocation3 + $0x30c] ss:$16 sps:$4 sm:$0xff]  }
  0xde   :  { %v396_v33 = vmul.f32 %v4881_v41, %v298_v52  ;;  %v397_v18 = vmul.f32 %v4884_v42, %v298_v52  ;;  %v398_v4 = vmul.f32 %v4888_v43, %v298_v52  ;;  %v399_v35 = vmul.f32 %v4892_v44, %v298_v52  ;;  %1587 = vmatprep.subr.bf16.mxu0 %v4318_v32  ;;  %v318_v26 = vpop.permute.xlu0 %317 }
  0xdf   :  { %v543_v10 = vadd.f32 %v4920_v60, %v457_v27  ;;  %v542_v25 = vadd.f32 %v4923_v61, %v456_v29  ;;  %v255_v16 = vmul.f32 %v4906_v48, %v152_v2  ;;  %1813 = vmatprep.subr.bf16.mxu1 %v4321_v9  ;;  %v417_v32 = vmul.f32 %v4884_v42, %v318_v26 }
  0xe0   :  { %v460_v31 = vadd.f32 %v396_v33, %v232_v11  ;;  %v461_v38 = vadd.f32 %v397_v18, %v233_v12  ;;  %v5139_v21 = vadd.f32 %v398_v4, %v5045_v8  ;;  %v5142_v52 = vadd.f32 %v399_v35, %v5054_v30  ;;  %v4333_v33 = vld [vmem:[#allocation3 + $0x32c] ss:$16 sps:$4 sm:$0xff]  }
  0xe1   :  { %1588 = vmatpush1.bf16.msra.mxu0 %v4316_v59  ;;  %v418_v27 = vmul.f32 %v4888_v43, %v318_v26  ;;  %v419_v29 = vmul.f32 %v4892_v44, %v318_v26  ;;  %1814 = vmatpush1.bf16.msra.mxu1 %v4319_v63  ;;  %v5150_v8 = vmul.f32 %v4895_v45, %v152_v2  ;;  %v4330_v59 = vld [vmem:[#allocation3 + $0x324] ss:$16 sps:$4 sm:$0xff]   ;;  %v607_v4 = vmax.f32 %v543_v10, 0.0 }
  0xe2   :  { %v137_v9 = vpop.permute.xlu1 %136  ;;  %v547_v11 = vadd.f32 %v4920_v60, %v461_v38  ;;  %v546_v12 = vadd.f32 %v4923_v61, %v460_v31  ;;  %1589 = vmatprep.subr.bf16.mxu0 %v4324_v40  ;;  %v5154_v30 = vadd.f32 %v4923_v61, %v5098_v57  ;;  %v606_v35 = vmax.f32 %v542_v25, 0.0  ;;  %1815 = vmatprep.subr.bf16.mxu1 %v4327_v58  ;;  %v4331_v58 = vld [vmem:[#allocation3 + $0x328] ss:$16 sps:$4 sm:$0xff]  }
  0xe3   :  { %v242_v18 = vmul.f32 %v4902_v47, %v137_v9  ;;  %v243_v63 = vmul.f32 %v4906_v48, %v137_v9  ;;  %v5158_v31 = vadd.f32 %v418_v27, %v254_v20  ;;  %v5160_v2 = vadd.f32 %v419_v29, %v255_v16 }
  0xe4   :  { %v611_v38 = vmax.f32 %v547_v11, 0.0  ;;  %v610_v36 = vmax.f32 %v546_v12, 0.0  ;;  %v5163_v40 = vmul.f32 %v4881_v41, %v318_v26  ;;  %v5165_v57 = vadd.f32 %v417_v32, %v253_v23  ;;  %v4328_v23 = vld [vmem:[#allocation3 + $0x320] ss:$16 sps:$4 sm:$0xff]   ;;  %v4339_v32 = vld [vmem:[#allocation3 + $0x34c] ss:$16 sps:$4 sm:$0xff]  }
  0xe5   :  { %1590 = vmatpush1.bf16.msra.mxu0 %v4322_v34  ;;  %1816 = vmatpush1.bf16.msra.mxu1 %v4325_v37  ;;  %v593_v14 = vmax.f32 %v529_v7, 0.0  ;;  %v597_v56 = vmax.f32 %v533_v19, 0.0  ;;  %v615_v10 = vmax.f32 %v5124_v0, 0.0  ;;  %v528_v20 = vadd.f32 %v4909_v50, %v5013_v22  ;;  %v4336_v19 = vld [vmem:[#allocation3 + $0x344] ss:$16 sps:$4 sm:$0xff]  }
  0xe6   :  { %v655_v53 = vpack.c.bf16 %v611_v38, %v607_v4  ;;  %v654_v54 = vpack.c.bf16 %v610_v36, %v606_v35  ;;  %1591 = vmatprep.subr.bf16.mxu0 %v4330_v59  ;;  %1817 = vmatprep.subr.bf16.mxu1 %v4333_v33  ;;  %v240_v25 = vmul.f32 %v4895_v45, %v137_v9  ;;  %v4334_v59 = vld [vmem:[#allocation3 + $0x340] ss:$16 sps:$4 sm:$0xff]   ;;  %v4337_v33 = vld [vmem:[#allocation3 + $0x348] ss:$16 sps:$4 sm:$0xff]  }
  0xe7   :  { %v241_v26 = vmul.f32 %v4898_v46, %v137_v9  ;;  %v306_v16 = vpop.permute.xlu1 %305  ;;  %v5172_v34 = vpack.c.bf16 %v597_v56, %v593_v14  ;;  %v532_v37 = vadd.f32 %v4909_v50, %v5030_v55  ;;  %v592_v27 = vmax.f32 %v528_v20, 0.0 }
  0xe8   :  { %v404_v36 = vmul.f32 %v4881_v41, %v306_v16  ;;  %v405_v0 = vmul.f32 %v4884_v42, %v306_v16  ;;  %v406_v7 = vmul.f32 %v4888_v43, %v306_v16  ;;  %v407_v22 = vmul.f32 %v4892_v44, %v306_v16  ;;  %1532 = vmatprep.mubr.bf16.mxu0 %v655_v53 }
  0xe9   :  { %1758 = vmatprep.mubr.bf16.mxu1 %v655_v53  ;;  %1533 = vmatmul.mubr.bf16.gmra.mrb[16].mxu0 %v654_v54  ;;  %v596_v29 = vmax.f32 %v532_v37, 0.0  ;;  %v537_v56 = vadd.f32 %v4926_v62, %v5036_v3  ;;  %v541_v55 = vadd.f32 %v4926_v62, %v5077_v15  ;;  %v536_v3 = vadd.f32 %v4909_v50, %v5026_v1 }
  0xea   :  { %v468_v14 = vadd.f32 %v404_v36, %v240_v25  ;;  %v469_v9 = vadd.f32 %v405_v0, %v241_v26  ;;  %v5184_v11 = vadd.f32 %v406_v7, %v242_v18  ;;  %v471_v12 = vadd.f32 %v407_v22, %v243_v63  ;;  %1759 = vmatmul.mubr.bf16.gmra.mrb[16].mxu1 %v654_v54  ;;  %v4342_v54 = vld [vmem:[#allocation3 + $0x364] ss:$16 sps:$4 sm:$0xff]   ;;  %v4345_v63 = vld [vmem:[#allocation3 + $0x36c] ss:$16 sps:$4 sm:$0xff]  }
  0xeb   :  { %1592 = vmatpush1.bf16.msra.mxu0 %v4328_v23  ;;  %1818 = vmatpush1.bf16.msra.mxu1 %v4331_v58  ;;  %v5186_v53 = vpack.c.bf16 %v596_v29, %v592_v27  ;;  %v601_v4 = vmax.f32 %v537_v56, 0.0  ;;  %v605_v35 = vmax.f32 %v541_v55, 0.0  ;;  %v614_v18 = vmax.f32 %v5154_v30, 0.0  ;;  %v4340_v27 = vld [vmem:[#allocation3 + $0x360] ss:$16 sps:$4 sm:$0xff]  }
  0xec   :  { %v142_v38 = vpop.permute.xlu1 %141  ;;  %v555_v15 = vadd.f32 %v4920_v60, %v469_v9  ;;  %v554_v20 = vadd.f32 %v4923_v61, %v468_v14  ;;  %1593 = vmatprep.subr.bf16.mxu0 %v4336_v19  ;;  %1819 = vmatprep.subr.bf16.mxu1 %v4339_v32  ;;  %v540_v25 = vadd.f32 %v4909_v50, %v5075_v13  ;;  %v600_v30 = vmax.f32 %v536_v3, 0.0  ;;  %v4343_v55 = vld [vmem:[#allocation3 + $0x368] ss:$16 sps:$4 sm:$0xff]  }
  0xed   :  { %v244_v26 = vmul.f32 %v4895_v45, %v142_v38  ;;  %v245_v16 = vmul.f32 %v4898_v46, %v142_v38  ;;  %v246_v1 = vmul.f32 %v4902_v47, %v142_v38  ;;  %v247_v23 = vmul.f32 %v4906_v48, %v142_v38 }
  0xee   :  { %v619_v58 = vmax.f32 %v555_v15, 0.0  ;;  %v618_v37 = vmax.f32 %v554_v20, 0.0  ;;  %v5199_v36 = vpack.c.bf16 %v605_v35, %v601_v4  ;;  %v604_v0 = vmax.f32 %v540_v25, 0.0  ;;  %v4348_v4 = vld [vmem:[#allocation3 + $0x384] ss:$16 sps:$4 sm:$0xff]  }
  0xef   :  { %1594 = vmatpush1.bf16.msra.mxu0 %v4334_v59  ;;  %1820 = vmatpush1.bf16.msra.mxu1 %v4337_v33  ;;  %v545_v7 = vadd.f32 %v4926_v62, %v5121_v51  ;;  %v549_v13 = vadd.f32 %v4926_v62, %v5142_v52  ;;  %v544_v22 = vadd.f32 %v4909_v50, %v5119_v49 }
  0xf0   :  { %v659_v19 = vpack.c.bf16 %v619_v58, %v615_v10  ;;  %v658_v32 = vpack.c.bf16 %v618_v37, %v614_v18  ;;  %1595 = vmatprep.subr.bf16.mxu0 %v4342_v54  ;;  %1821 = vmatprep.subr.bf16.mxu1 %v4345_v63  ;;  %v548_v29 = vadd.f32 %v4909_v50, %v5139_v21  ;;  %v4351_v21 = vld [vmem:[#allocation3 + $0x38c] ss:$16 sps:$4 sm:$0xff]   ;;  %v4346_v58 = vld [vmem:[#allocation3 + $0x380] ss:$16 sps:$4 sm:$0xff]   ;;  %v4349_v37 = vld [vmem:[#allocation3 + $0x388] ss:$16 sps:$4 sm:$0xff]  }
  0xf1   :  { %v310_v56 = vpop.permute.xlu1 %309  ;;  %v5209_v14 = vpack.c.bf16 %v604_v0, %v600_v30  ;;  %v609_v9 = vmax.f32 %v545_v7, 0.0  ;;  %v613_v51 = vmax.f32 %v549_v13, 0.0  ;;  %v608_v59 = vmax.f32 %v544_v22, 0.0 }
  0xf2   :  { %v408_v52 = vmul.f32 %v4881_v41, %v310_v56  ;;  %v409_v33 = vmul.f32 %v4884_v42, %v310_v56  ;;  %v410_v49 = vmul.f32 %v4888_v43, %v310_v56  ;;  %v411_v10 = vmul.f32 %v4892_v44, %v310_v56  ;;  %1542 = vmatprep.mubr.bf16.mxu0 %v659_v19 }
  0xf3   :  { %1768 = vmatprep.mubr.bf16.mxu1 %v659_v19  ;;  %1543 = vmatmul.mubr.bf16.gmra.mrb[20].mxu0 %v658_v32  ;;  %v5215_v35 = vpack.c.bf16 %v613_v51, %v609_v9  ;;  %v612_v3 = vmax.f32 %v548_v29, 0.0  ;;  %v553_v38 = vadd.f32 %v4926_v62, %v5096_v39  ;;  %v557_v15 = vadd.f32 %v4926_v62, %v471_v12  ;;  %v4352_v51 = vld [vmem:[#allocation3 + $0x3a0] ss:$16 sps:$4 sm:$0xff]  }
  0xf4   :  { %v472_v20 = vadd.f32 %v408_v52, %v244_v26  ;;  %v473_v18 = vadd.f32 %v409_v33, %v245_v16  ;;  %v474_v54 = vadd.f32 %v410_v49, %v246_v1  ;;  %v475_v63 = vadd.f32 %v411_v10, %v247_v23  ;;  %1769 = vmatmul.mubr.bf16.gmra.mrb[20].mxu1 %v658_v32  ;;  %v4354_v1 = vld [vmem:[#allocation3 + $0x3a4] ss:$16 sps:$4 sm:$0xff]   ;;  %v4357_v23 = vld [vmem:[#allocation3 + $0x3ac] ss:$16 sps:$4 sm:$0xff]  }
  0xf5   :  { %v314_v25 = vpop.permute.xlu1 %313  ;;  %1596 = vmatpush1.bf16.msra.mxu0 %v4340_v27  ;;  %1822 = vmatpush1.bf16.msra.mxu1 %v4343_v55  ;;  %v5220_v30 = vpack.c.bf16 %v612_v3, %v608_v59  ;;  %v617_v0 = vmax.f32 %v553_v38, 0.0  ;;  %v621_v7 = vmax.f32 %v557_v15, 0.0  ;;  %v552_v13 = vadd.f32 %v4909_v50, %v5094_v5  ;;  %v4355_v59 = vld [vmem:[#allocation3 + $0x3a8] ss:$16 sps:$4 sm:$0xff]  }
  0xf6   :  { %v412_v39 = vmul.f32 %v4881_v41, %v314_v25  ;;  %v413_v12 = vmul.f32 %v4884_v42, %v314_v25  ;;  %v414_v26 = vmul.f32 %v4888_v43, %v314_v25  ;;  %v415_v16 = vmul.f32 %v4892_v44, %v314_v25  ;;  %1597 = vmatprep.subr.bf16.mxu0 %v4348_v4 }
  0xf7   :  { %v559_v22 = vadd.f32 %v4920_v60, %v473_v18  ;;  %v558_v19 = vadd.f32 %v4923_v61, %v472_v20  ;;  %1823 = vmatprep.subr.bf16.mxu1 %v4351_v21  ;;  %v5230_v32 = vpack.c.bf16 %v621_v7, %v617_v0  ;;  %v556_v5 = vadd.f32 %v4909_v50, %v5184_v11 }
  0xf8   :  { %v476_v27 = vadd.f32 %v412_v39, %v5104_v28  ;;  %v477_v29 = vadd.f32 %v413_v12, %v5113_v6  ;;  %v478_v56 = vadd.f32 %v414_v26, %v5101_v17  ;;  %v479_v55 = vadd.f32 %v415_v16, %v5116_v24  ;;  %v4360_v24 = vld [vmem:[#allocation3 + $0x3c4] ss:$16 sps:$4 sm:$0xff]  }
  0xf9   :  { %v480_v9 = vadd.f32 %v5163_v40, %v5150_v8  ;;  %1598 = vmatpush1.bf16.msra.mxu0 %v4346_v58  ;;  %1824 = vmatpush1.bf16.msra.mxu1 %v4349_v37  ;;  %v5242_v52 = vadd.f32 %v4920_v60, %v5165_v57  ;;  %v616_v11 = vmax.f32 %v552_v13, 0.0  ;;  %v620_v33 = vmax.f32 %v556_v5, 0.0  ;;  %v4363_v8 = vld [vmem:[#allocation3 + $0x3cc] ss:$16 sps:$4 sm:$0xff]   ;;  %v4358_v58 = vld [vmem:[#allocation3 + $0x3c0] ss:$16 sps:$4 sm:$0xff]  }
  0xfa   :  { %v157_v28 = vpop.permute.xlu1 %156  ;;  %v563_v6 = vadd.f32 %v4920_v60, %v477_v29  ;;  %v623_v49 = vmax.f32 %v559_v22, 0.0  ;;  %v562_v17 = vadd.f32 %v4923_v61, %v476_v27  ;;  %1599 = vmatprep.subr.bf16.mxu0 %v4354_v1  ;;  %1825 = vmatprep.subr.bf16.mxu1 %v4357_v23  ;;  %v561_v40 = vadd.f32 %v4926_v62, %v475_v63  ;;  %v4361_v13 = vld [vmem:[#allocation3 + $0x3c8] ss:$16 sps:$4 sm:$0xff]   ;;  %v4366_v23 = vld [vmem:[#allocation3 + $0x3e4] ss:$16 sps:$4 sm:$0xff]  }
  0xfb   :  { %v256_v10 = vmul.f32 %v4895_v45, %v157_v28  ;;  %v257_v4 = vmul.f32 %v4898_v46, %v157_v28  ;;  %v258_v57 = vmul.f32 %v4902_v47, %v157_v28  ;;  %v622_v21 = vmax.f32 %v558_v19, 0.0  ;;  %v4369_v22 = vld [vmem:[#allocation3 + $0x3ec] ss:$16 sps:$4 sm:$0xff]  }
  0xfc   :  { %v627_v3 = vmax.f32 %v563_v6, 0.0  ;;  %v626_v38 = vmax.f32 %v562_v17, 0.0  ;;  %v5250_v15 = vpack.c.bf16 %v620_v33, %v616_v11  ;;  %v565_v20 = vadd.f32 %v4926_v62, %v479_v55 }
  0xfd   :  { %1600 = vmatpush1.bf16.msra.mxu0 %v4352_v51  ;;  %1826 = vmatpush1.bf16.msra.mxu1 %v4355_v59  ;;  %v560_v18 = vadd.f32 %v4909_v50, %v474_v54  ;;  %v564_v25 = vadd.f32 %v4909_v50, %v478_v56  ;;  %v569_v45 = vadd.f32 %v4926_v62, %v5160_v2  ;;  %v625_v39 = vmax.f32 %v561_v40, 0.0  ;;  %v4375_v51 = vld [vmem:[#allocation5 + $0xc] ss:$16 sps:$4 sm:$0xff]  }
  0xfe   :  { %v663_v63 = vpack.c.bf16 %v627_v3, %v623_v49  ;;  %v662_v46 = vpack.c.bf16 %v626_v38, %v622_v21  ;;  %1601 = vmatprep.subr.bf16.mxu0 %v4360_v24  ;;  %1827 = vmatprep.subr.bf16.mxu1 %v4363_v8  ;;  %v629_v47 = vmax.f32 %v565_v20, 0.0  ;;  %v568_v37 = vadd.f32 %v4909_v50, %v5158_v31  ;;  %v5716_v21 = vld [vmem:[#allocation14_spill] sm:$0xff]  ;;  %v5717_v3 = vld [vmem:[#allocation15_spill] sm:$0xff] }
  0xff   :  { %v259_v0 = vmul.f32 %v4906_v48, %v157_v28  ;;  %v322_v7 = vpop.permute.xlu1 %321  ;;  %v624_v54 = vmax.f32 %v560_v18, 0.0  ;;  %v628_v12 = vmax.f32 %v564_v25, 0.0  ;;  %v566_v48 = vadd.f32 %v4923_v61, %v480_v9  ;;  %v4372_v9 = vld [vmem:[#allocation5 + $0x4] ss:$16 sps:$4 sm:$0xff]   ;;  %v4376_v38 = vld [vmem:[#allocation5 + $0x20] ss:$16 sps:$4 sm:$0xff]  }
 0x100   :  { %v420_v26 = vmul.f32 %v4881_v41, %v322_v7  ;;  %v421_v2 = vmul.f32 %v4884_v42, %v322_v7  ;;  %v422_v16 = vmul.f32 %v4888_v43, %v322_v7  ;;  %v423_v1 = vmul.f32 %v4892_v44, %v322_v7  ;;  %1552 = vmatprep.mubr.bf16.mxu0 %v663_v63  ;;  %v4364_v42 = vld [vmem:[#allocation3 + $0x3e0] ss:$16 sps:$4 sm:$0xff]   ;;  %v4367_v43 = vld [vmem:[#allocation3 + $0x3e8] ss:$16 sps:$4 sm:$0xff]   ;;  %v4384_v18 = vld [vmem:[#allocation5 + $0x44] ss:$16 sps:$4 sm:$0xff]  }
 0x101   :  { %1778 = vmatprep.mubr.bf16.mxu1 %v663_v63  ;;  %1553 = vmatmul.mubr.bf16.gmra.mrb[24].mxu0 %v662_v46  ;;  %v5265_v31 = vpack.c.bf16 %v629_v47, %v625_v39  ;;  %v5267_v19 = vpack.c.bf16 %v628_v12, %v624_v54  ;;  %v631_v59 = vmax.f32 %v5242_v52, 0.0  ;;  %v630_v11 = vmax.f32 %v566_v48, 0.0  ;;  %v4370_v52 = vld [vmem:[#allocation5] ss:$16 sps:$4 sm:$0xff]   ;;  %v4379_v20 = vld [vmem:[#allocation5 + $0x28] ss:$16 sps:$4 sm:$0xff]  }
 0x102   :  { %v484_v5 = vadd.f32 %v420_v26, %v256_v10  ;;  %v485_v27 = vadd.f32 %v421_v2, %v257_v4  ;;  %v486_v41 = vadd.f32 %v422_v16, %v258_v57  ;;  %v487_v29 = vadd.f32 %v423_v1, %v259_v0  ;;  %1779 = vmatmul.mubr.bf16.gmra.mrb[24].mxu1 %v662_v46  ;;  %v4373_v10 = vld [vmem:[#allocation5 + $0x8] ss:$16 sps:$4 sm:$0xff]   ;;  %v4378_v4 = vld [vmem:[#allocation5 + $0x24] ss:$16 sps:$4 sm:$0xff]   ;;  %v4381_v57 = vld [vmem:[#allocation5 + $0x2c] ss:$16 sps:$4 sm:$0xff]  }
 0x103   :  { %1602 = vmatpush1.bf16.msra.mxu0 %v4358_v58  ;;  %1828 = vmatpush1.bf16.msra.mxu1 %v4361_v13  ;;  %v633_v49 = vmax.f32 %v569_v45, 0.0  ;;  %v4387_v25 = vld [vmem:[#allocation5 + $0x4c] ss:$16 sps:$4 sm:$0xff]   ;;  %v4382_v45 = vld [vmem:[#allocation5 + $0x40] ss:$16 sps:$4 sm:$0xff]  }
 0x104   :  { %v571_v44 = vadd.f32 %v4920_v60, %v485_v27  ;;  %v570_v56 = vadd.f32 %v4923_v61, %v484_v5  ;;  %1603 = vmatprep.subr.bf16.mxu0 %v4366_v23  ;;  %1829 = vmatprep.subr.bf16.mxu1 %v4369_v22  ;;  %v573_v55 = vadd.f32 %v4926_v62, %v487_v29  ;;  %v632_v60 = vmax.f32 %v568_v37, 0.0  ;;  %v4385_v63 = vld [vmem:[#allocation5 + $0x48] ss:$16 sps:$4 sm:$0xff]   ;;  %v4390_v46 = vld [vmem:[#allocation5 + $0x64] ss:$16 sps:$4 sm:$0xff]  }
 0x105   :  { %v572_v33 = vadd.f32 %v4909_v50, %v486_v41  ;;  %v5715_v50 = vld [vmem:[#allocation13_spill] sm:$0xff]  ;;  %v4393_v58 = vld [vmem:[#allocation5 + $0x6c] ss:$16 sps:$4 sm:$0xff]   ;;  %v4391_v0 = vld [vmem:[#allocation5 + $0x68] ss:$16 sps:$4 sm:$0xff]  }
 0x106   :  { %v635_v28 = vmax.f32 %v571_v44, 0.0  ;;  %v634_v6 = vmax.f32 %v570_v56, 0.0  ;;  %v637_v17 = vmax.f32 %v573_v55, 0.0  ;;  %v5718_v47 = vld [vmem:[#allocation16_spill] sm:$0xff]  ;;  %v4388_v37 = vld [vmem:[#allocation5 + $0x60] ss:$16 sps:$4 sm:$0xff]  }
 0x107   :  { %1604 = vmatpush1.bf16.msra.mxu0 %v4364_v42  ;;  %1830 = vmatpush1.bf16.msra.mxu1 %v4367_v43  ;;  %v636_v24 = vmax.f32 %v572_v33, 0.0  ;;  %v4396_v7 = vld [vmem:[#allocation5 + $0x84] ss:$16 sps:$4 sm:$0xff]   ;;  %v4399_v13 = vld [vmem:[#allocation5 + $0x8c] ss:$16 sps:$4 sm:$0xff]  }
 0x108   :  { %v667_v61 = vpack.c.bf16 %v635_v28, %v631_v59  ;;  %v666_v8 = vpack.c.bf16 %v634_v6, %v630_v11  ;;  %v5274_v40 = vpack.c.bf16 %v637_v17, %v633_v49  ;;  %2798 = vmatprep.subr.bf16.mxu0 %v4372_v9  ;;  %3024 = vmatprep.subr.bf16.mxu1 %v4375_v51  ;;  %v4394_v39 = vld [vmem:[#allocation5 + $0x80] ss:$16 sps:$4 sm:$0xff]   ;;  %v4397_v54 = vld [vmem:[#allocation5 + $0x88] ss:$16 sps:$4 sm:$0xff]   ;;  %v4402_v12 = vld [vmem:[#allocation5 + $0xa4] ss:$16 sps:$4 sm:$0xff]  }
 0x109   :  { %v5276_v62 = vpack.c.bf16 %v636_v24, %v632_v60  ;;  %v4405_v26 = vld [vmem:[#allocation5 + $0xac] ss:$16 sps:$4 sm:$0xff]   ;;  %v4403_v2 = vld [vmem:[#allocation5 + $0xa8] ss:$16 sps:$4 sm:$0xff]   ;;  %v4408_v16 = vld [vmem:[#allocation5 + $0xc4] ss:$16 sps:$4 sm:$0xff]  }
 0x10a   :  { %1562 = vmatprep.mubr.bf16.mxu0 %v667_v61  ;;  %1788 = vmatprep.mubr.bf16.mxu1 %v667_v61  ;;  %v4411_v1 = vld [vmem:[#allocation5 + $0xcc] ss:$16 sps:$4 sm:$0xff]   ;;  %v4406_v23 = vld [vmem:[#allocation5 + $0xc0] ss:$16 sps:$4 sm:$0xff]   ;;  %v4409_v22 = vld [vmem:[#allocation5 + $0xc8] ss:$16 sps:$4 sm:$0xff]  }
 0x10b   :  { %1563 = vmatmul.mubr.bf16.gmra.mrb[28].mxu0 %v666_v8  ;;  %1789 = vmatmul.mubr.bf16.gmra.mrb[28].mxu1 %v666_v8  ;;  %v4414_v48 = vld [vmem:[#allocation5 + $0xe4] ss:$16 sps:$4 sm:$0xff]   ;;  %v4415_v5 = vld [vmem:[#allocation5 + $0xe8] ss:$16 sps:$4 sm:$0xff]   ;;  %v4423_v41 = vld [vmem:[#allocation5 + $0x10c] ss:$16 sps:$4 sm:$0xff]  }
 0x10c   :  { %1605 = vmatprep.mubr.bf16.mxu0 %v5715_v50  ;;  %1831 = vmatprep.mubr.bf16.mxu1 %v5715_v50  ;;  %v4420_v27 = vld [vmem:[#allocation5 + $0x104] ss:$16 sps:$4 sm:$0xff]   ;;  %v4418_v29 = vld [vmem:[#allocation5 + $0x100] ss:$16 sps:$4 sm:$0xff]   ;;  %v4421_v42 = vld [vmem:[#allocation5 + $0x108] ss:$16 sps:$4 sm:$0xff]  }
 0x10d   :  { %v4426_v43 = vld [vmem:[#allocation5 + $0x124] ss:$16 sps:$4 sm:$0xff]   ;;  %v4427_v44 = vld [vmem:[#allocation5 + $0x128] ss:$16 sps:$4 sm:$0xff]   ;;  %v4435_v55 = vld [vmem:[#allocation5 + $0x14c] ss:$16 sps:$4 sm:$0xff]  }
 0x10e   :  { %v4432_v56 = vld [vmem:[#allocation5 + $0x144] ss:$16 sps:$4 sm:$0xff]   ;;  %v4430_v9 = vld [vmem:[#allocation5 + $0x140] ss:$16 sps:$4 sm:$0xff]   ;;  %v4433_v51 = vld [vmem:[#allocation5 + $0x148] ss:$16 sps:$4 sm:$0xff]  }
 0x10f   :  { %v4438_v59 = vld [vmem:[#allocation5 + $0x164] ss:$16 sps:$4 sm:$0xff]   ;;  %v4439_v11 = vld [vmem:[#allocation5 + $0x168] ss:$16 sps:$4 sm:$0xff]   ;;  %v4447_v28 = vld [vmem:[#allocation5 + $0x18c] ss:$16 sps:$4 sm:$0xff]  }
 0x110   :  { %v4444_v33 = vld [vmem:[#allocation5 + $0x184] ss:$16 sps:$4 sm:$0xff]   ;;  %v4442_v6 = vld [vmem:[#allocation5 + $0x180] ss:$16 sps:$4 sm:$0xff]   ;;  %v4445_v49 = vld [vmem:[#allocation5 + $0x188] ss:$16 sps:$4 sm:$0xff]  }
 0x111   :  { %v4450_v17 = vld [vmem:[#allocation5 + $0x1a4] ss:$16 sps:$4 sm:$0xff]   ;;  %v4451_v60 = vld [vmem:[#allocation5 + $0x1a8] ss:$16 sps:$4 sm:$0xff]   ;;  %v4454_v24 = vld [vmem:[#allocation5 + $0x1c0] ss:$16 sps:$4 sm:$0xff]  }
 0x112   :  { %v4456_v61 = vld [vmem:[#allocation5 + $0x1c4] ss:$16 sps:$4 sm:$0xff]   ;;  %v4457_v8 = vld [vmem:[#allocation5 + $0x1c8] ss:$16 sps:$4 sm:$0xff]  }
 0x113   :  { %1606 = vmatmul.mubr.bf16.vlgmr.msra.gmra.mrb[0].mxu0 %v5716_v21  ;;  %1832 = vmatmul.mubr.bf16.vlgmr.msra.gmra.mrb[0].mxu1 %v5716_v21  ;;  %v4462_v50 = vld [vmem:[#allocation5 + $0x1e4] ss:$16 sps:$4 sm:$0xff]  }
 0x114   :  { %1615 = vmatprep.mubr.bf16.mxu0 %v5717_v3  ;;  %1841 = vmatprep.mubr.bf16.mxu1 %v5717_v3  ;;  %v5719_v21 = vld [vmem:[#allocation11_spill] sm:$0xff] }
 0x115   :  { %2799 = vmatpush1.bf16.msra.mxu0 %v4370_v52  ;;  %3025 = vmatpush1.bf16.msra.mxu1 %v4373_v10  ;;  %v4465_v52 = vld [vmem:[#allocation5 + $0x1ec] ss:$16 sps:$4 sm:$0xff]   ;;  %v4463_v10 = vld [vmem:[#allocation5 + $0x1e8] ss:$16 sps:$4 sm:$0xff]  }
 0x116   :  { %2800 = vmatprep.subr.bf16.mxu0 %v4378_v4  ;;  %3026 = vmatprep.subr.bf16.mxu1 %v4381_v57  ;;  %v4468_v4 = vld [vmem:[#allocation5 + $0x204] ss:$16 sps:$4 sm:$0xff]   ;;  %v4471_v57 = vld [vmem:[#allocation5 + $0x20c] ss:$16 sps:$4 sm:$0xff]  }
 0x119   :  { %2801 = vmatpush1.bf16.msra.mxu0 %v4376_v38  ;;  %3027 = vmatpush1.bf16.msra.mxu1 %v4379_v20  ;;  %v5720_v38 = vld [vmem:[#allocation12_spill] sm:$0xff] }
 0x11a   :  { %2802 = vmatprep.subr.bf16.mxu0 %v4384_v18  ;;  %3028 = vmatprep.subr.bf16.mxu1 %v4387_v25  ;;  %v5721_v18 = vld [vmem:[#allocation9_spill] sm:$0xff] }
 0x11b   :  { %1616 = vmatmul.mubr.bf16.gmra.mrb[4].mxu0 %v5718_v47  ;;  %1842 = vmatmul.mubr.bf16.gmra.mrb[4].mxu1 %v5718_v47 }
 0x11c   :  { %1625 = vmatprep.mubr.bf16.mxu0 %v5172_v34  ;;  %1851 = vmatprep.mubr.bf16.mxu1 %v5172_v34  ;;  %v4400_v34 = vld [vmem:[#allocation5 + $0xa0] ss:$16 sps:$4 sm:$0xff]  }
 0x11d   :  { %2803 = vmatpush1.bf16.msra.mxu0 %v4382_v45  ;;  %3029 = vmatpush1.bf16.msra.mxu1 %v4385_v63  ;;  %v5722_v45 = vld [vmem:[#allocation10_spill] sm:$0xff] }
 0x11e   :  { %2804 = vmatprep.subr.bf16.mxu0 %v4390_v46  ;;  %3030 = vmatprep.subr.bf16.mxu1 %v4393_v58 }
 0x121   :  { %2805 = vmatpush1.bf16.msra.mxu0 %v4388_v37  ;;  %3031 = vmatpush1.bf16.msra.mxu1 %v4391_v0 }
 0x122   :  { %2806 = vmatprep.subr.bf16.mxu0 %v4396_v7  ;;  %3032 = vmatprep.subr.bf16.mxu1 %v4399_v13 }
 0x123   :  { %1626 = vmatmul.mubr.bf16.gmra.mrb[8].mxu0 %v5186_v53  ;;  %1852 = vmatmul.mubr.bf16.gmra.mrb[8].mxu1 %v5186_v53  ;;  %v4417_v53 = vld [vmem:[#allocation5 + $0xec] ss:$16 sps:$4 sm:$0xff]  }
 0x124   :  { %1635 = vmatprep.mubr.bf16.mxu0 %v5199_v36  ;;  %1861 = vmatprep.mubr.bf16.mxu1 %v5199_v36  ;;  %v4412_v36 = vld [vmem:[#allocation5 + $0xe0] ss:$16 sps:$4 sm:$0xff]  }
 0x125   :  { %2807 = vmatpush1.bf16.msra.mxu0 %v4394_v39  ;;  %3033 = vmatpush1.bf16.msra.mxu1 %v4397_v54 }
 0x126   :  { %2808 = vmatprep.subr.bf16.mxu0 %v4402_v12  ;;  %3034 = vmatprep.subr.bf16.mxu1 %v4405_v26 }
 0x129   :  { %2809 = vmatpush1.bf16.msra.mxu0 %v4400_v34  ;;  %3035 = vmatpush1.bf16.msra.mxu1 %v4403_v2 }
 0x12a   :  { %2810 = vmatprep.subr.bf16.mxu0 %v4408_v16  ;;  %3036 = vmatprep.subr.bf16.mxu1 %v4411_v1 }
 0x12b   :  { %1636 = vmatmul.mubr.bf16.gmra.mrb[12].mxu0 %v5209_v14  ;;  %1862 = vmatmul.mubr.bf16.gmra.mrb[12].mxu1 %v5209_v14  ;;  %v4429_v14 = vld [vmem:[#allocation5 + $0x12c] ss:$16 sps:$4 sm:$0xff]  }
 0x12c   :  { %1645 = vmatprep.mubr.bf16.mxu0 %v5215_v35  ;;  %1871 = vmatprep.mubr.bf16.mxu1 %v5215_v35  ;;  %v4424_v35 = vld [vmem:[#allocation5 + $0x120] ss:$16 sps:$4 sm:$0xff]  }
 0x12d   :  { %2811 = vmatpush1.bf16.msra.mxu0 %v4406_v23  ;;  %3037 = vmatpush1.bf16.msra.mxu1 %v4409_v22 }
 0x12e   :  { %2812 = vmatprep.subr.bf16.mxu0 %v4414_v48  ;;  %3038 = vmatprep.subr.bf16.mxu1 %v4417_v53 }
 0x131   :  { %2813 = vmatpush1.bf16.msra.mxu0 %v4412_v36  ;;  %3039 = vmatpush1.bf16.msra.mxu1 %v4415_v5 }
 0x132   :  { %2814 = vmatprep.subr.bf16.mxu0 %v4420_v27  ;;  %3040 = vmatprep.subr.bf16.mxu1 %v4423_v41 }
 0x133   :  { %1646 = vmatmul.mubr.bf16.gmra.mrb[16].mxu0 %v5220_v30  ;;  %1872 = vmatmul.mubr.bf16.gmra.mrb[16].mxu1 %v5220_v30  ;;  %v4441_v30 = vld [vmem:[#allocation5 + $0x16c] ss:$16 sps:$4 sm:$0xff]  }
 0x134   :  { %1655 = vmatprep.mubr.bf16.mxu0 %v5230_v32  ;;  %1881 = vmatprep.mubr.bf16.mxu1 %v5230_v32  ;;  %v4436_v32 = vld [vmem:[#allocation5 + $0x160] ss:$16 sps:$4 sm:$0xff]  }
 0x135   :  { %2815 = vmatpush1.bf16.msra.mxu0 %v4418_v29  ;;  %3041 = vmatpush1.bf16.msra.mxu1 %v4421_v42 }
 0x136   :  { %2816 = vmatprep.subr.bf16.mxu0 %v4426_v43  ;;  %3042 = vmatprep.subr.bf16.mxu1 %v4429_v14 }
 0x139   :  { %2817 = vmatpush1.bf16.msra.mxu0 %v4424_v35  ;;  %3043 = vmatpush1.bf16.msra.mxu1 %v4427_v44 }
 0x13a   :  { %2818 = vmatprep.subr.bf16.mxu0 %v4432_v56  ;;  %3044 = vmatprep.subr.bf16.mxu1 %v4435_v55  ;;  %v4466_v55 = vld [vmem:[#allocation5 + $0x200] ss:$16 sps:$4 sm:$0xff]  }
 0x13b   :  { %1656 = vmatmul.mubr.bf16.gmra.mrb[20].mxu0 %v5250_v15  ;;  %1882 = vmatmul.mubr.bf16.gmra.mrb[20].mxu1 %v5250_v15  ;;  %v4453_v15 = vld [vmem:[#allocation5 + $0x1ac] ss:$16 sps:$4 sm:$0xff]  }
 0x13c   :  { %1665 = vmatprep.mubr.bf16.mxu0 %v5265_v31  ;;  %1891 = vmatprep.mubr.bf16.mxu1 %v5265_v31  ;;  %v4448_v31 = vld [vmem:[#allocation5 + $0x1a0] ss:$16 sps:$4 sm:$0xff]  }
 0x13d   :  { %2819 = vmatpush1.bf16.msra.mxu0 %v4430_v9  ;;  %3045 = vmatpush1.bf16.msra.mxu1 %v4433_v51  ;;  %v4469_v9 = vld [vmem:[#allocation5 + $0x208] ss:$16 sps:$4 sm:$0xff]  }
 0x13e   :  { %2820 = vmatprep.subr.bf16.mxu0 %v4438_v59  ;;  %3046 = vmatprep.subr.bf16.mxu1 %v4441_v30 }
 0x141   :  { %2821 = vmatpush1.bf16.msra.mxu0 %v4436_v32  ;;  %3047 = vmatpush1.bf16.msra.mxu1 %v4439_v11  ;;  %v4474_v11 = vld [vmem:[#allocation5 + $0x224] ss:$16 sps:$4 sm:$0xff]  }
 0x142   :  { %2822 = vmatprep.subr.bf16.mxu0 %v4444_v33  ;;  %3048 = vmatprep.subr.bf16.mxu1 %v4447_v28  ;;  %v4477_v33 = vld [vmem:[#allocation5 + $0x22c] ss:$16 sps:$4 sm:$0xff]  }
 0x143   :  { %1666 = vmatmul.mubr.bf16.gmra.mrb[24].mxu0 %v5267_v19  ;;  %1892 = vmatmul.mubr.bf16.gmra.mrb[24].mxu1 %v5267_v19  ;;  %v4459_v19 = vld [vmem:[#allocation5 + $0x1cc] ss:$16 sps:$4 sm:$0xff]  }
 0x144   :  { %1675 = vmatprep.mubr.bf16.mxu0 %v5274_v40  ;;  %1901 = vmatprep.mubr.bf16.mxu1 %v5274_v40  ;;  %v4460_v40 = vld [vmem:[#allocation5 + $0x1e0] ss:$16 sps:$4 sm:$0xff]  }
 0x145   :  { %2823 = vmatpush1.bf16.msra.mxu0 %v4442_v6  ;;  %3049 = vmatpush1.bf16.msra.mxu1 %v4445_v49 }
 0x146   :  { %2824 = vmatprep.subr.bf16.mxu0 %v4450_v17  ;;  %3050 = vmatprep.subr.bf16.mxu1 %v4453_v15 }
 0x149   :  { %2825 = vmatpush1.bf16.msra.mxu0 %v4448_v31  ;;  %3051 = vmatpush1.bf16.msra.mxu1 %v4451_v60 }
 0x14a   :  { %2826 = vmatprep.subr.bf16.mxu0 %v4456_v61  ;;  %3052 = vmatprep.subr.bf16.mxu1 %v4459_v19  ;;  %v4472_v19 = vld [vmem:[#allocation5 + $0x220] ss:$16 sps:$4 sm:$0xff]  }
 0x14b   :  { %1676 = vmatmul.mubr.bf16.gmra.mrb[28].mxu0 %v5276_v62  ;;  %1902 = vmatmul.mubr.bf16.gmra.mrb[28].mxu1 %v5276_v62  ;;  %v798_v62 = vld [vmem:[%s5689_s4] sm:$0xf] }
 0x14c   :  { %v5314_v3 = vrot.slane %v798_v62, %v5719_v21  ;;  %v5317_v20 = vrot.slane %v798_v62, %v5720_v38  ;;  %v5320_v25 = vrot.slane %v798_v62, %v5721_v18  ;;  %v5323_v63 = vrot.slane %v798_v62, %v5722_v45  ;;  %v4483_v62 = vld [vmem:[#allocation5 + $0x24c] ss:$16 sps:$4 sm:$0xff]  }
 0x14d   :  { %2827 = vmatpush1.bf16.msra.mxu0 %v4454_v24  ;;  %3053 = vmatpush1.bf16.msra.mxu1 %v4457_v8 }
 0x14e   :  { %2828 = vmatprep.subr.bf16.mxu0 %v4462_v50  ;;  %3054 = vmatprep.subr.bf16.mxu1 %v4465_v52  ;;  %v4475_v50 = vld [vmem:[#allocation5 + $0x228] ss:$16 sps:$4 sm:$0xff]   ;;  %v4480_v52 = vld [vmem:[#allocation5 + $0x244] ss:$16 sps:$4 sm:$0xff]  }
 0x151   :  { %2829 = vmatpush1.bf16.msra.mxu0 %v4460_v40  ;;  %3055 = vmatpush1.bf16.msra.mxu1 %v4463_v10 }
 0x152   :  { %2911 = vmatprep.subr.bf16.mxu0 %v4468_v4  ;;  %3137 = vmatprep.subr.bf16.mxu1 %v4471_v57 }
 0x1e6   :  { %v1607_v46 = vpop.f32.mrb[0].mxu0  ;;  %v1833_v58 = vpop.f32.mrb[0].mxu1 }
 0x1e7   :  { %v3895_v47 = vadd.f32 %v1607_v46, %v5314_v3  ;;  %v3927_v37 = vadd.f32 %v1833_v58, %v5317_v20  ;;  %v1609_v0 = vpop.f32.mrb[1].mxu0  ;;  %v1835_v7 = vpop.f32.mrb[1].mxu1 }
 0x1e8   :  { %v3896_v13 = vadd.f32 %v1609_v0, %v5320_v25  ;;  %v3928_v39 = vadd.f32 %v1835_v7, %v5323_v63  ;;  %v1611_v54 = vpop.f32.mrb[2].mxu0  ;;  %v1837_v12 = vpop.f32.mrb[2].mxu1 }
 0x1e9   :  { %v3897_v26 = vadd.f32 %v1611_v54, %v5314_v3  ;;  %v3929_v34 = vadd.f32 %v1837_v12, %v5317_v20  ;;  %v1613_v2 = vpop.f32.mrb[3].mxu0  ;;  %v1839_v16 = vpop.f32.mrb[3].mxu1  ;;  %v1912_v22 = vmax.f32 %v3895_v47, 0.0  ;;  %v1914_v48 = vmax.f32 %v3927_v37, 0.0 }
 0x1ea   :  { %v3898_v1 = vadd.f32 %v1613_v2, %v5320_v25  ;;  %v3930_v23 = vadd.f32 %v1839_v16, %v5323_v63  ;;  %v1913_v5 = vmax.f32 %v3896_v13, 0.0  ;;  %v1915_v27 = vmax.f32 %v3928_v39, 0.0 }
 0x1eb   :  { %v1916_v53 = vmax.f32 %v3897_v26, 0.0  ;;  %v1918_v36 = vmax.f32 %v3929_v34, 0.0  ;;  %v4478_v26 = vld [vmem:[#allocation5 + $0x240] ss:$16 sps:$4 sm:$0xff]   ;;  %v4481_v34 = vld [vmem:[#allocation5 + $0x248] ss:$16 sps:$4 sm:$0xff]  }
 0x1ec   :  { %v1917_v41 = vmax.f32 %v3898_v1, 0.0  ;;  %v1919_v29 = vmax.f32 %v3930_v23, 0.0 }
 0x1ed   :  { %v1976_v42 = vpack.c.bf16 %v1916_v53, %v1912_v22  ;;  %v5333_v43 = vpack.c.bf16 %v1918_v36, %v1914_v48  ;;  %v4486_v22 = vld [vmem:[#allocation5 + $0x264] ss:$16 sps:$4 sm:$0xff]   ;;  %v4489_v48 = vld [vmem:[#allocation5 + $0x26c] ss:$16 sps:$4 sm:$0xff]  }
 0x1ee   :  { %v1977_v14 = vpack.c.bf16 %v1917_v41, %v1913_v5  ;;  %v5335_v35 = vpack.c.bf16 %v1919_v29, %v1915_v27  ;;  %v1617_v44 = vpop.f32.mrb[4].mxu0  ;;  %v1843_v56 = vpop.f32.mrb[4].mxu1 }
 0x1ef   :  { %v3899_v51 = vadd.f32 %v1617_v44, %v5314_v3  ;;  %v3931_v59 = vadd.f32 %v1843_v56, %v5317_v20  ;;  %v1619_v30 = vpop.f32.mrb[5].mxu0  ;;  %v1845_v32 = vpop.f32.mrb[5].mxu1 }
 0x1f0   :  { %v3900_v28 = vadd.f32 %v1619_v30, %v5320_v25  ;;  %v3932_v6 = vadd.f32 %v1845_v32, %v5323_v63  ;;  %v1621_v49 = vpop.f32.mrb[6].mxu0  ;;  %v1847_v17 = vpop.f32.mrb[6].mxu1  ;;  %2830 = vmatprep.mubr.bf16.mxu0 %v1977_v14  ;;  %3056 = vmatprep.mubr.bf16.mxu1 %v1977_v14 }
 0x1f1   :  { %v3901_v15 = vadd.f32 %v1621_v49, %v5314_v3  ;;  %v3933_v31 = vadd.f32 %v1847_v17, %v5317_v20  ;;  %v1623_v60 = vpop.f32.mrb[7].mxu0  ;;  %v1849_v24 = vpop.f32.mrb[7].mxu1  ;;  %2831 = vmatmul.mubr.bf16.vlgmr.msra.gmra.mrb[32].mxu0 %v1976_v42  ;;  %3057 = vmatmul.mubr.bf16.vlgmr.msra.gmra.mrb[32].mxu1 %v1976_v42  ;;  %v1920_v40 = vmax.f32 %v3899_v51, 0.0  ;;  %v1922_v10 = vmax.f32 %v3931_v59, 0.0  ;;  %v4492_v51 = vld [vmem:[#allocation5 + $0x284] ss:$16 sps:$4 sm:$0xff]  }
 0x1f2   :  { %v3902_v61 = vadd.f32 %v1623_v60, %v5320_v25  ;;  %v3934_v8 = vadd.f32 %v1849_v24, %v5323_v63  ;;  %2912 = vmatpush1.bf16.msra.mxu0 %v4466_v55  ;;  %3138 = vmatpush1.bf16.msra.mxu1 %v4469_v9  ;;  %v1921_v46 = vmax.f32 %v3900_v28, 0.0  ;;  %v1923_v58 = vmax.f32 %v3932_v6, 0.0  ;;  %v4484_v55 = vld [vmem:[#allocation5 + $0x260] ss:$16 sps:$4 sm:$0xff]   ;;  %v4487_v9 = vld [vmem:[#allocation5 + $0x268] ss:$16 sps:$4 sm:$0xff]  }
 0x1f3   :  { %v1924_v4 = vmax.f32 %v3901_v15, 0.0  ;;  %v1926_v57 = vmax.f32 %v3933_v31, 0.0  ;;  %2913 = vmatprep.subr.bf16.mxu0 %v4474_v11  ;;  %3139 = vmatprep.subr.bf16.mxu1 %v4477_v33  ;;  %v4495_v33 = vld [vmem:[#allocation5 + $0x28c] ss:$16 sps:$4 sm:$0xff]  }
 0x1f4   :  { %v1925_v47 = vmax.f32 %v3902_v61, 0.0  ;;  %v1927_v37 = vmax.f32 %v3934_v8, 0.0 }
 0x1f5   :  { %v1980_v0 = vpack.c.bf16 %v1924_v4, %v1920_v40  ;;  %v5345_v7 = vpack.c.bf16 %v1926_v57, %v1922_v10  ;;  %v4498_v57 = vld [vmem:[#allocation5 + $0x2a4] ss:$16 sps:$4 sm:$0xff]  }
 0x1f6   :  { %v1981_v13 = vpack.c.bf16 %v1925_v47, %v1921_v46  ;;  %v5347_v39 = vpack.c.bf16 %v1927_v37, %v1923_v58  ;;  %2914 = vmatpush1.bf16.msra.mxu0 %v4472_v19  ;;  %v1627_v54 = vpop.f32.mrb[8].mxu0  ;;  %v1853_v12 = vpop.f32.mrb[8].mxu1  ;;  %3140 = vmatpush1.bf16.msra.mxu1 %v4475_v50  ;;  %v4490_v19 = vld [vmem:[#allocation5 + $0x280] ss:$16 sps:$4 sm:$0xff]   ;;  %v4493_v50 = vld [vmem:[#allocation5 + $0x288] ss:$16 sps:$4 sm:$0xff]  }
 0x1f7   :  { %v3903_v2 = vadd.f32 %v1627_v54, %v5314_v3  ;;  %v3935_v16 = vadd.f32 %v1853_v12, %v5317_v20  ;;  %v1629_v1 = vpop.f32.mrb[9].mxu0  ;;  %v1855_v23 = vpop.f32.mrb[9].mxu1  ;;  %2915 = vmatprep.subr.bf16.mxu0 %v4480_v52  ;;  %3141 = vmatprep.subr.bf16.mxu1 %v4483_v62  ;;  %v4501_v62 = vld [vmem:[#allocation5 + $0x2ac] ss:$16 sps:$4 sm:$0xff]  }
 0x1f8   :  { %v3904_v53 = vadd.f32 %v1629_v1, %v5320_v25  ;;  %v3936_v36 = vadd.f32 %v1855_v23, %v5323_v63  ;;  %v1631_v5 = vpop.f32.mrb[10].mxu0  ;;  %v1857_v27 = vpop.f32.mrb[10].mxu1  ;;  %2840 = vmatprep.mubr.bf16.mxu0 %v1981_v13  ;;  %3066 = vmatprep.mubr.bf16.mxu1 %v1981_v13  ;;  %v4504_v1 = vld [vmem:[#allocation5 + $0x2c4] ss:$16 sps:$4 sm:$0xff]  }
 0x1f9   :  { %v3905_v41 = vadd.f32 %v1631_v5, %v5314_v3  ;;  %v3937_v29 = vadd.f32 %v1857_v27, %v5317_v20  ;;  %v1633_v42 = vpop.f32.mrb[11].mxu0  ;;  %v1859_v14 = vpop.f32.mrb[11].mxu1  ;;  %2841 = vmatmul.mubr.bf16.gmra.mrb[36].mxu0 %v1980_v0  ;;  %3067 = vmatmul.mubr.bf16.gmra.mrb[36].mxu1 %v1980_v0  ;;  %v1928_v59 = vmax.f32 %v3903_v2, 0.0  ;;  %v1930_v30 = vmax.f32 %v3935_v16, 0.0  ;;  %v4496_v2 = vld [vmem:[#allocation5 + $0x2a0] ss:$16 sps:$4 sm:$0xff]  }
 0x1fa   :  { %v3906_v44 = vadd.f32 %v1633_v42, %v5320_v25  ;;  %v3938_v56 = vadd.f32 %v1859_v14, %v5323_v63  ;;  %2916 = vmatpush1.bf16.msra.mxu0 %v4478_v26  ;;  %3142 = vmatpush1.bf16.msra.mxu1 %v4481_v34  ;;  %v1929_v28 = vmax.f32 %v3904_v53, 0.0  ;;  %v1931_v6 = vmax.f32 %v3936_v36, 0.0  ;;  %v4499_v16 = vld [vmem:[#allocation5 + $0x2a8] ss:$16 sps:$4 sm:$0xff]   ;;  %v4507_v36 = vld [vmem:[#allocation5 + $0x2cc] ss:$16 sps:$4 sm:$0xff]  }
 0x1fb   :  { %v1932_v32 = vmax.f32 %v3905_v41, 0.0  ;;  %v1934_v11 = vmax.f32 %v3937_v29, 0.0  ;;  %2917 = vmatprep.subr.bf16.mxu0 %v4486_v22  ;;  %3143 = vmatprep.subr.bf16.mxu1 %v4489_v48 }
 0x1fc   :  { %v1933_v49 = vmax.f32 %v3906_v44, 0.0  ;;  %v1935_v17 = vmax.f32 %v3938_v56, 0.0 }
 0x1fd   :  { %v1984_v15 = vpack.c.bf16 %v1932_v32, %v1928_v59  ;;  %v5357_v31 = vpack.c.bf16 %v1934_v11, %v1930_v30  ;;  %v4505_v59 = vld [vmem:[#allocation5 + $0x2c8] ss:$16 sps:$4 sm:$0xff]  }
 0x1fe   :  { %v1985_v60 = vpack.c.bf16 %v1933_v49, %v1929_v28  ;;  %v5359_v24 = vpack.c.bf16 %v1935_v17, %v1931_v6  ;;  %2918 = vmatpush1.bf16.msra.mxu0 %v4484_v55  ;;  %v1637_v61 = vpop.f32.mrb[12].mxu0  ;;  %v1863_v8 = vpop.f32.mrb[12].mxu1  ;;  %3144 = vmatpush1.bf16.msra.mxu1 %v4487_v9  ;;  %v4510_v28 = vld [vmem:[#allocation5 + $0x2e4] ss:$16 sps:$4 sm:$0xff]   ;;  %v4513_v6 = vld [vmem:[#allocation5 + $0x2ec] ss:$16 sps:$4 sm:$0xff]  }
 0x1ff   :  { %v3907_v52 = vadd.f32 %v1637_v61, %v5314_v3  ;;  %v3939_v40 = vadd.f32 %v1863_v8, %v5317_v20  ;;  %v1639_v10 = vpop.f32.mrb[13].mxu0  ;;  %v1865_v4 = vpop.f32.mrb[13].mxu1  ;;  %2919 = vmatprep.subr.bf16.mxu0 %v4492_v51  ;;  %3145 = vmatprep.subr.bf16.mxu1 %v4495_v33  ;;  %v4502_v51 = vld [vmem:[#allocation5 + $0x2c0] ss:$16 sps:$4 sm:$0xff]  }
 0x200   :  { %v3908_v46 = vadd.f32 %v1639_v10, %v5320_v25  ;;  %v3940_v58 = vadd.f32 %v1865_v4, %v5323_v63  ;;  %v1641_v47 = vpop.f32.mrb[14].mxu0  ;;  %v1867_v37 = vpop.f32.mrb[14].mxu1  ;;  %2850 = vmatprep.mubr.bf16.mxu0 %v1985_v60  ;;  %3076 = vmatprep.mubr.bf16.mxu1 %v1985_v60  ;;  %v4508_v10 = vld [vmem:[#allocation5 + $0x2e0] ss:$16 sps:$4 sm:$0xff]   ;;  %v4511_v4 = vld [vmem:[#allocation5 + $0x2e8] ss:$16 sps:$4 sm:$0xff]  }
 0x201   :  { %v3909_v0 = vadd.f32 %v1641_v47, %v5314_v3  ;;  %v3941_v13 = vadd.f32 %v1867_v37, %v5317_v20  ;;  %v1643_v54 = vpop.f32.mrb[15].mxu0  ;;  %v1869_v12 = vpop.f32.mrb[15].mxu1  ;;  %2851 = vmatmul.mubr.bf16.gmra.mrb[40].mxu0 %v1984_v15  ;;  %3077 = vmatmul.mubr.bf16.gmra.mrb[40].mxu1 %v1984_v15  ;;  %v1936_v23 = vmax.f32 %v3907_v52, 0.0  ;;  %v1938_v22 = vmax.f32 %v3939_v40, 0.0  ;;  %v4519_v37 = vld [vmem:[#allocation5 + $0x30c] ss:$16 sps:$4 sm:$0xff]  }
 0x202   :  { %v3910_v26 = vadd.f32 %v1643_v54, %v5320_v25  ;;  %v3942_v34 = vadd.f32 %v1869_v12, %v5323_v63  ;;  %2920 = vmatpush1.bf16.msra.mxu0 %v4490_v19  ;;  %3146 = vmatpush1.bf16.msra.mxu1 %v4493_v50  ;;  %v1937_v5 = vmax.f32 %v3908_v46, 0.0  ;;  %v1939_v27 = vmax.f32 %v3940_v58, 0.0 }
 0x203   :  { %v1940_v48 = vmax.f32 %v3909_v0, 0.0  ;;  %v1942_v53 = vmax.f32 %v3941_v13, 0.0  ;;  %2921 = vmatprep.subr.bf16.mxu0 %v4498_v57  ;;  %3147 = vmatprep.subr.bf16.mxu1 %v4501_v62  ;;  %v4516_v57 = vld [vmem:[#allocation5 + $0x304] ss:$16 sps:$4 sm:$0xff]  }
 0x204   :  { %v1941_v41 = vmax.f32 %v3910_v26, 0.0  ;;  %v1943_v29 = vmax.f32 %v3942_v34, 0.0 }
 0x205   :  { %v1988_v42 = vpack.c.bf16 %v1940_v48, %v1936_v23  ;;  %v5369_v14 = vpack.c.bf16 %v1942_v53, %v1938_v22  ;;  %v4514_v22 = vld [vmem:[#allocation5 + $0x300] ss:$16 sps:$4 sm:$0xff]   ;;  %v4517_v48 = vld [vmem:[#allocation5 + $0x308] ss:$16 sps:$4 sm:$0xff]  }
 0x206   :  { %v1989_v44 = vpack.c.bf16 %v1941_v41, %v1937_v5  ;;  %v5371_v56 = vpack.c.bf16 %v1943_v29, %v1939_v27  ;;  %2922 = vmatpush1.bf16.msra.mxu0 %v4496_v2  ;;  %v1647_v55 = vpop.f32.mrb[16].mxu0  ;;  %v1873_v9 = vpop.f32.mrb[16].mxu1  ;;  %3148 = vmatpush1.bf16.msra.mxu1 %v4499_v16  ;;  %v4522_v41 = vld [vmem:[#allocation5 + $0x324] ss:$16 sps:$4 sm:$0xff]   ;;  %v4525_v29 = vld [vmem:[#allocation5 + $0x32c] ss:$16 sps:$4 sm:$0xff]  }
 0x207   :  { %v3911_v30 = vadd.f32 %v1647_v55, %v5314_v3  ;;  %v3943_v32 = vadd.f32 %v1873_v9, %v5317_v20  ;;  %v1649_v11 = vpop.f32.mrb[17].mxu0  ;;  %v1875_v33 = vpop.f32.mrb[17].mxu1  ;;  %2923 = vmatprep.subr.bf16.mxu0 %v4504_v1  ;;  %3149 = vmatprep.subr.bf16.mxu1 %v4507_v36 }
 0x208   :  { %v3912_v49 = vadd.f32 %v1649_v11, %v5320_v25  ;;  %v3944_v17 = vadd.f32 %v1875_v33, %v5323_v63  ;;  %v1651_v15 = vpop.f32.mrb[18].mxu0  ;;  %v1877_v60 = vpop.f32.mrb[18].mxu1  ;;  %2860 = vmatprep.mubr.bf16.mxu0 %v1989_v44  ;;  %3086 = vmatprep.mubr.bf16.mxu1 %v1989_v44 }
 0x209   :  { %v3913_v61 = vadd.f32 %v1651_v15, %v5314_v3  ;;  %v3945_v8 = vadd.f32 %v1877_v60, %v5317_v20  ;;  %v1653_v19 = vpop.f32.mrb[19].mxu0  ;;  %v1879_v50 = vpop.f32.mrb[19].mxu1  ;;  %2861 = vmatmul.mubr.bf16.gmra.mrb[44].mxu0 %v1988_v42  ;;  %3087 = vmatmul.mubr.bf16.gmra.mrb[44].mxu1 %v1988_v42  ;;  %v1944_v62 = vmax.f32 %v3911_v30, 0.0  ;;  %v1946_v46 = vmax.f32 %v3943_v32, 0.0 }
 0x20a   :  { %v3914_v52 = vadd.f32 %v1653_v19, %v5320_v25  ;;  %v3946_v40 = vadd.f32 %v1879_v50, %v5323_v63  ;;  %2924 = vmatpush1.bf16.msra.mxu0 %v4502_v51  ;;  %3150 = vmatpush1.bf16.msra.mxu1 %v4505_v59  ;;  %v1945_v0 = vmax.f32 %v3912_v49, 0.0  ;;  %v1947_v13 = vmax.f32 %v3944_v17, 0.0  ;;  %v4528_v49 = vld [vmem:[#allocation5 + $0x344] ss:$16 sps:$4 sm:$0xff]  }
 0x20b   :  { %v1948_v58 = vmax.f32 %v3913_v61, 0.0  ;;  %v1950_v47 = vmax.f32 %v3945_v8, 0.0  ;;  %2925 = vmatprep.subr.bf16.mxu0 %v4510_v28  ;;  %3151 = vmatprep.subr.bf16.mxu1 %v4513_v6  ;;  %v4520_v28 = vld [vmem:[#allocation5 + $0x320] ss:$16 sps:$4 sm:$0xff]   ;;  %v4523_v6 = vld [vmem:[#allocation5 + $0x328] ss:$16 sps:$4 sm:$0xff]  }
 0x20c   :  { %v1949_v54 = vmax.f32 %v3914_v52, 0.0  ;;  %v1951_v12 = vmax.f32 %v3946_v40, 0.0  ;;  %v4531_v8 = vld [vmem:[#allocation5 + $0x34c] ss:$16 sps:$4 sm:$0xff]  }
 0x20d   :  { %v1992_v26 = vpack.c.bf16 %v1948_v58, %v1944_v62  ;;  %v5381_v34 = vpack.c.bf16 %v1950_v47, %v1946_v46  ;;  %v4526_v47 = vld [vmem:[#allocation5 + $0x340] ss:$16 sps:$4 sm:$0xff]  }
 0x20e   :  { %v1993_v2 = vpack.c.bf16 %v1949_v54, %v1945_v0  ;;  %v5383_v16 = vpack.c.bf16 %v1951_v12, %v1947_v13  ;;  %2926 = vmatpush1.bf16.msra.mxu0 %v4508_v10  ;;  %v1657_v1 = vpop.f32.mrb[20].mxu0  ;;  %v1883_v23 = vpop.f32.mrb[20].mxu1  ;;  %3152 = vmatpush1.bf16.msra.mxu1 %v4511_v4 }
 0x20f   :  { %v3915_v53 = vadd.f32 %v1657_v1, %v5314_v3  ;;  %v3947_v36 = vadd.f32 %v1883_v23, %v5317_v20  ;;  %v1659_v5 = vpop.f32.mrb[21].mxu0  ;;  %v1885_v27 = vpop.f32.mrb[21].mxu1  ;;  %2927 = vmatprep.subr.bf16.mxu0 %v4516_v57  ;;  %3153 = vmatprep.subr.bf16.mxu1 %v4519_v37  ;;  %v4529_v37 = vld [vmem:[#allocation5 + $0x348] ss:$16 sps:$4 sm:$0xff]  }
 0x210   :  { %v3916_v42 = vadd.f32 %v1659_v5, %v5320_v25  ;;  %v3948_v44 = vadd.f32 %v1885_v27, %v5323_v63  ;;  %v1661_v55 = vpop.f32.mrb[22].mxu0  ;;  %v1887_v9 = vpop.f32.mrb[22].mxu1  ;;  %2870 = vmatprep.mubr.bf16.mxu0 %v1993_v2  ;;  %3096 = vmatprep.mubr.bf16.mxu1 %v1993_v2  ;;  %v4537_v2 = vld [vmem:[#allocation5 + $0x36c] ss:$16 sps:$4 sm:$0xff]  }
 0x211   :  { %v3917_v51 = vadd.f32 %v1661_v55, %v5314_v3  ;;  %v3949_v59 = vadd.f32 %v1887_v9, %v5317_v20  ;;  %v1663_v30 = vpop.f32.mrb[23].mxu0  ;;  %v1889_v32 = vpop.f32.mrb[23].mxu1  ;;  %2871 = vmatmul.mubr.bf16.gmra.mrb[48].mxu0 %v1992_v26  ;;  %3097 = vmatmul.mubr.bf16.gmra.mrb[48].mxu1 %v1992_v26  ;;  %v1952_v17 = vmax.f32 %v3915_v53, 0.0  ;;  %v1954_v15 = vmax.f32 %v3947_v36, 0.0  ;;  %v4534_v26 = vld [vmem:[#allocation5 + $0x364] ss:$16 sps:$4 sm:$0xff]  }
 0x212   :  { %v3918_v11 = vadd.f32 %v1663_v30, %v5320_v25  ;;  %v3950_v33 = vadd.f32 %v1889_v32, %v5323_v63  ;;  %2928 = vmatpush1.bf16.msra.mxu0 %v4514_v22  ;;  %3154 = vmatpush1.bf16.msra.mxu1 %v4517_v48  ;;  %v1953_v19 = vmax.f32 %v3916_v42, 0.0  ;;  %v1955_v50 = vmax.f32 %v3948_v44, 0.0  ;;  %v4532_v42 = vld [vmem:[#allocation5 + $0x360] ss:$16 sps:$4 sm:$0xff]   ;;  %v4535_v44 = vld [vmem:[#allocation5 + $0x368] ss:$16 sps:$4 sm:$0xff]  }
 0x213   :  { %v1956_v60 = vmax.f32 %v3917_v51, 0.0  ;;  %v1958_v61 = vmax.f32 %v3949_v59, 0.0  ;;  %2929 = vmatprep.subr.bf16.mxu0 %v4522_v41  ;;  %3155 = vmatprep.subr.bf16.mxu1 %v4525_v29  ;;  %v4540_v55 = vld [vmem:[#allocation5 + $0x384] ss:$16 sps:$4 sm:$0xff]   ;;  %v4543_v32 = vld [vmem:[#allocation5 + $0x38c] ss:$16 sps:$4 sm:$0xff]  }
 0x214   :  { %v1957_v52 = vmax.f32 %v3918_v11, 0.0  ;;  %v1959_v40 = vmax.f32 %v3950_v33, 0.0 }
 0x215   :  { %v1996_v10 = vpack.c.bf16 %v1956_v60, %v1952_v17  ;;  %v5393_v4 = vpack.c.bf16 %v1958_v61, %v1954_v15 }
 0x216   :  { %v1997_v57 = vpack.c.bf16 %v1957_v52, %v1953_v19  ;;  %v5395_v62 = vpack.c.bf16 %v1959_v40, %v1955_v50  ;;  %2930 = vmatpush1.bf16.msra.mxu0 %v4520_v28  ;;  %v1667_v46 = vpop.f32.mrb[24].mxu0  ;;  %v1893_v58 = vpop.f32.mrb[24].mxu1  ;;  %3156 = vmatpush1.bf16.msra.mxu1 %v4523_v6  ;;  %v4538_v19 = vld [vmem:[#allocation5 + $0x380] ss:$16 sps:$4 sm:$0xff]   ;;  %v4541_v50 = vld [vmem:[#allocation5 + $0x388] ss:$16 sps:$4 sm:$0xff]  }
 0x217   :  { %v3919_v0 = vadd.f32 %v1667_v46, %v5314_v3  ;;  %v3951_v13 = vadd.f32 %v1893_v58, %v5317_v20  ;;  %v1669_v54 = vpop.f32.mrb[25].mxu0  ;;  %v1895_v12 = vpop.f32.mrb[25].mxu1  ;;  %2931 = vmatprep.subr.bf16.mxu0 %v4528_v49  ;;  %3157 = vmatprep.subr.bf16.mxu1 %v4531_v8  ;;  %v4546_v46 = vld [vmem:[#allocation5 + $0x3a4] ss:$16 sps:$4 sm:$0xff]   ;;  %v4549_v58 = vld [vmem:[#allocation5 + $0x3ac] ss:$16 sps:$4 sm:$0xff]  }
 0x218   :  { %v3920_v1 = vadd.f32 %v1669_v54, %v5320_v25  ;;  %v3952_v23 = vadd.f32 %v1895_v12, %v5323_v63  ;;  %v1671_v22 = vpop.f32.mrb[26].mxu0  ;;  %v1897_v48 = vpop.f32.mrb[26].mxu1  ;;  %2880 = vmatprep.mubr.bf16.mxu0 %v1997_v57  ;;  %3106 = vmatprep.mubr.bf16.mxu1 %v1997_v57 }
 0x219   :  { %v3921_v53 = vadd.f32 %v1671_v22, %v5314_v3  ;;  %v3953_v36 = vadd.f32 %v1897_v48, %v5317_v20  ;;  %v1673_v5 = vpop.f32.mrb[27].mxu0  ;;  %v1899_v27 = vpop.f32.mrb[27].mxu1  ;;  %2881 = vmatmul.mubr.bf16.gmra.mrb[52].mxu0 %v1996_v10  ;;  %3107 = vmatmul.mubr.bf16.gmra.mrb[52].mxu1 %v1996_v10  ;;  %v1960_v9 = vmax.f32 %v3919_v0, 0.0  ;;  %v1962_v51 = vmax.f32 %v3951_v13, 0.0  ;;  %v4544_v22 = vld [vmem:[#allocation5 + $0x3a0] ss:$16 sps:$4 sm:$0xff]  }
 0x21a   :  { %v3922_v41 = vadd.f32 %v1673_v5, %v5320_v25  ;;  %v3954_v29 = vadd.f32 %v1899_v27, %v5323_v63  ;;  %2932 = vmatpush1.bf16.msra.mxu0 %v4526_v47  ;;  %3158 = vmatpush1.bf16.msra.mxu1 %v4529_v37  ;;  %v1961_v11 = vmax.f32 %v3920_v1, 0.0  ;;  %v1963_v33 = vmax.f32 %v3952_v23, 0.0  ;;  %v4547_v48 = vld [vmem:[#allocation5 + $0x3a8] ss:$16 sps:$4 sm:$0xff]  }
 0x21b   :  { %v1964_v59 = vmax.f32 %v3921_v53, 0.0  ;;  %v1966_v30 = vmax.f32 %v3953_v36, 0.0  ;;  %2933 = vmatprep.subr.bf16.mxu0 %v4534_v26  ;;  %3159 = vmatprep.subr.bf16.mxu1 %v4537_v2  ;;  %v4552_v53 = vld [vmem:[#allocation5 + $0x3c4] ss:$16 sps:$4 sm:$0xff]  }
 0x21c   :  { %v1965_v28 = vmax.f32 %v3922_v41, 0.0  ;;  %v1967_v6 = vmax.f32 %v3954_v29, 0.0 }
 0x21d   :  { %v2000_v49 = vpack.c.bf16 %v1964_v59, %v1960_v9  ;;  %v5405_v17 = vpack.c.bf16 %v1966_v30, %v1962_v51  ;;  %v4550_v51 = vld [vmem:[#allocation5 + $0x3c0] ss:$16 sps:$4 sm:$0xff]   ;;  %v4553_v59 = vld [vmem:[#allocation5 + $0x3c8] ss:$16 sps:$4 sm:$0xff]   ;;  %v4558_v30 = vld [vmem:[#allocation5 + $0x3e4] ss:$16 sps:$4 sm:$0xff]  }
 0x21e   :  { %v2001_v15 = vpack.c.bf16 %v1965_v28, %v1961_v11  ;;  %v5407_v60 = vpack.c.bf16 %v1967_v6, %v1963_v33  ;;  %2934 = vmatpush1.bf16.msra.mxu0 %v4532_v42  ;;  %v1677_v61 = vpop.f32.mrb[28].mxu0  ;;  %v1903_v8 = vpop.f32.mrb[28].mxu1  ;;  %3160 = vmatpush1.bf16.msra.mxu1 %v4535_v44  ;;  %v4556_v11 = vld [vmem:[#allocation5 + $0x3e0] ss:$16 sps:$4 sm:$0xff]   ;;  %v4559_v33 = vld [vmem:[#allocation5 + $0x3e8] ss:$16 sps:$4 sm:$0xff]  }
 0x21f   :  { %v3923_v52 = vadd.f32 %v1677_v61, %v5314_v3  ;;  %v3955_v40 = vadd.f32 %v1903_v8, %v5317_v20  ;;  %v1679_v10 = vpop.f32.mrb[29].mxu0  ;;  %v1905_v57 = vpop.f32.mrb[29].mxu1  ;;  %2935 = vmatprep.subr.bf16.mxu0 %v4540_v55  ;;  %3161 = vmatprep.subr.bf16.mxu1 %v4543_v32  ;;  %v4561_v32 = vld [vmem:[#allocation5 + $0x3ec] ss:$16 sps:$4 sm:$0xff]  }
 0x220   :  { %v3924_v47 = vadd.f32 %v1679_v10, %v5320_v25  ;;  %v3956_v37 = vadd.f32 %v1905_v57, %v5323_v63  ;;  %v1681_v0 = vpop.f32.mrb[30].mxu0  ;;  %v1907_v13 = vpop.f32.mrb[30].mxu1  ;;  %2890 = vmatprep.mubr.bf16.mxu0 %v2001_v15  ;;  %3116 = vmatprep.mubr.bf16.mxu1 %v2001_v15 }
 0x221   :  { %v3925_v54 = vadd.f32 %v1681_v0, %v5314_v3  ;;  %v3957_v12 = vadd.f32 %v1907_v13, %v5317_v20  ;;  %v1683_v26 = vpop.f32.mrb[31].mxu0  ;;  %v1909_v2 = vpop.f32.mrb[31].mxu1  ;;  %2891 = vmatmul.mubr.bf16.gmra.mrb[56].mxu0 %v2000_v49  ;;  %3117 = vmatmul.mubr.bf16.gmra.mrb[56].mxu1 %v2000_v49  ;;  %v1968_v36 = vmax.f32 %v3923_v52, 0.0  ;;  %v1970_v5 = vmax.f32 %v3955_v40, 0.0  ;;  %v4555_v3 = vld [vmem:[#allocation5 + $0x3cc] ss:$16 sps:$4 sm:$0xff]  }
 0x222   :  { %v3926_v1 = vadd.f32 %v1683_v26, %v5320_v25  ;;  %v3958_v23 = vadd.f32 %v1909_v2, %v5323_v63  ;;  %2936 = vmatpush1.bf16.msra.mxu0 %v4538_v19  ;;  %3162 = vmatpush1.bf16.msra.mxu1 %v4541_v50  ;;  %v1969_v20 = vmax.f32 %v3924_v47, 0.0  ;;  %v1971_v29 = vmax.f32 %v3956_v37, 0.0 }
 0x223   :  { %v1972_v27 = vmax.f32 %v3925_v54, 0.0  ;;  %v1974_v41 = vmax.f32 %v3957_v12, 0.0  ;;  %2937 = vmatprep.subr.bf16.mxu0 %v4546_v46  ;;  %3163 = vmatprep.subr.bf16.mxu1 %v4549_v58 }
 0x224   :  { %v1973_v42 = vmax.f32 %v3926_v1, 0.0  ;;  %v1975_v44 = vmax.f32 %v3958_v23, 0.0 }
 0x225   :  { %v2004_v55 = vpack.c.bf16 %v1972_v27, %v1968_v36  ;;  %v2006_v25 = vpack.c.bf16 %v1974_v41, %v1970_v5 }
 0x226   :  { %v2005_v9 = vpack.c.bf16 %v1973_v42, %v1969_v20  ;;  %v2007_v63 = vpack.c.bf16 %v1975_v44, %v1971_v29  ;;  %2938 = vmatpush1.bf16.msra.mxu0 %v4544_v22  ;;  %3164 = vmatpush1.bf16.msra.mxu1 %v4547_v48 }
 0x227   :  { %2939 = vmatprep.subr.bf16.mxu0 %v4552_v53  ;;  %3165 = vmatprep.subr.bf16.mxu1 %v4555_v3 }
 0x228   :  { %2900 = vmatprep.mubr.bf16.mxu0 %v2005_v9  ;;  %3126 = vmatprep.mubr.bf16.mxu1 %v2005_v9 }
 0x229   :  { %2901 = vmatmul.mubr.bf16.gmra.mrb[60].mxu0 %v2004_v55  ;;  %3127 = vmatmul.mubr.bf16.gmra.mrb[60].mxu1 %v2004_v55 }
 0x22a   :  { %2940 = vmatpush1.bf16.msra.mxu0 %v4550_v51  ;;  %2943 = vmatprep.mubr.bf16.mxu0 %v5335_v35 }
 0x22b   :  { %3166 = vmatpush1.bf16.msra.mxu1 %v4553_v59  ;;  %3169 = vmatprep.mubr.bf16.mxu1 %v5335_v35 }
 0x22c   :  { %2941 = vmatprep.subr.bf16.mxu0 %v4558_v30  ;;  %3167 = vmatprep.subr.bf16.mxu1 %v4561_v32 }
 0x22e   :  { %2942 = vmatpush1.bf16.msra.mxu0 %v4556_v11 }
 0x22f   :  { %3168 = vmatpush1.bf16.msra.mxu1 %v4559_v33 }
 0x231   :  { %2944 = vmatmul.mubr.bf16.vlgmr.msra.gmra.mrb[32].mxu0 %v5333_v43 }
 0x232   :  { %3170 = vmatmul.mubr.bf16.vlgmr.msra.gmra.mrb[32].mxu1 %v5333_v43  ;;  %2953 = vmatprep.mubr.bf16.mxu0 %v5347_v39  ;;  %v2136_v43 = vld [vmem:[%s5691_s6] sm:$0xf] }
 0x233   :  { %3179 = vmatprep.mubr.bf16.mxu1 %v5347_v39  ;;  %v5449_v35 = vrot.slane %v2136_v43, %v5719_v21  ;;  %v5455_v39 = vrot.slane %v2136_v43, %v5720_v38 }
 0x239   :  { %2954 = vmatmul.mubr.bf16.gmra.mrb[36].mxu0 %v5345_v7 }
 0x23a   :  { %3180 = vmatmul.mubr.bf16.gmra.mrb[36].mxu1 %v5345_v7  ;;  %2963 = vmatprep.mubr.bf16.mxu0 %v5359_v24  ;;  %v3314_v7 = vld [vmem:[%s5692_s7] sm:$0xf] }
 0x23b   :  { %3189 = vmatprep.mubr.bf16.mxu1 %v5359_v24  ;;  %v5461_v24 = vrot.slane %v2136_v43, %v5722_v45  ;;  %v5470_v6 = vrot.slane %v3314_v7, %v5721_v18  ;;  %v5478_v40 = vrot.slane %v3314_v7, %v5722_v45 }
 0x241   :  { %2964 = vmatmul.mubr.bf16.gmra.mrb[40].mxu0 %v5357_v31 }
 0x242   :  { %3190 = vmatmul.mubr.bf16.gmra.mrb[40].mxu1 %v5357_v31  ;;  %2973 = vmatprep.mubr.bf16.mxu0 %v5371_v56  ;;  %v5458_v31 = vrot.slane %v2136_v43, %v5721_v18 }
 0x243   :  { %3199 = vmatprep.mubr.bf16.mxu1 %v5371_v56 }
 0x249   :  { %2974 = vmatmul.mubr.bf16.gmra.mrb[44].mxu0 %v5369_v14 }
 0x24a   :  { %3200 = vmatmul.mubr.bf16.gmra.mrb[44].mxu1 %v5369_v14  ;;  %2983 = vmatprep.mubr.bf16.mxu0 %v5383_v16 }
 0x24b   :  { %3209 = vmatprep.mubr.bf16.mxu1 %v5383_v16 }
 0x251   :  { %2984 = vmatmul.mubr.bf16.gmra.mrb[48].mxu0 %v5381_v34 }
 0x252   :  { %3210 = vmatmul.mubr.bf16.gmra.mrb[48].mxu1 %v5381_v34  ;;  %2993 = vmatprep.mubr.bf16.mxu0 %v5395_v62  ;;  %v5465_v34 = vrot.slane %v3314_v7, %v5719_v21 }
 0x253   :  { %3219 = vmatprep.mubr.bf16.mxu1 %v5395_v62 }
 0x259   :  { %2994 = vmatmul.mubr.bf16.gmra.mrb[52].mxu0 %v5393_v4 }
 0x25a   :  { %3220 = vmatmul.mubr.bf16.gmra.mrb[52].mxu1 %v5393_v4  ;;  %3003 = vmatprep.mubr.bf16.mxu0 %v5407_v60 }
 0x25b   :  { %3229 = vmatprep.mubr.bf16.mxu1 %v5407_v60  ;;  %v5473_v60 = vrot.slane %v3314_v7, %v5720_v38 }
 0x261   :  { %3004 = vmatmul.mubr.bf16.gmra.mrb[56].mxu0 %v5405_v17 }
 0x262   :  { %3230 = vmatmul.mubr.bf16.gmra.mrb[56].mxu1 %v5405_v17  ;;  %3013 = vmatprep.mubr.bf16.mxu0 %v2007_v63 }
 0x263   :  { %3239 = vmatprep.mubr.bf16.mxu1 %v2007_v63 }
 0x269   :  { %3014 = vmatmul.mubr.bf16.gmra.mrb[60].mxu0 %v2006_v25 }
 0x26a   :  { %3240 = vmatmul.mubr.bf16.gmra.mrb[60].mxu1 %v2006_v25 }
 0x304   :  { %v2945_v14 = vpop.f32.mrb[32].mxu0 }
 0x305   :  { %v3959_v56 = vadd.f32 %v2945_v14, %v5449_v35  ;;  %v3171_v16 = vpop.f32.mrb[32].mxu1  ;;  %v2947_v4 = vpop.f32.mrb[33].mxu0 }
 0x306   :  { %v3991_v62 = vadd.f32 %v3171_v16, %v5455_v39  ;;  %v3960_v28 = vadd.f32 %v2947_v4, %v5458_v31  ;;  %v3173_v49 = vpop.f32.mrb[33].mxu1  ;;  %v2949_v17 = vpop.f32.mrb[34].mxu0 }
 0x307   :  { %v3250_v15 = vmax.f32 %v3959_v56, 0.0  ;;  %v3992_v61 = vadd.f32 %v3173_v49, %v5461_v24  ;;  %v3961_v21 = vadd.f32 %v2949_v17, %v5449_v35  ;;  %v3175_v8 = vpop.f32.mrb[34].mxu1  ;;  %v2951_v19 = vpop.f32.mrb[35].mxu0 }
 0x308   :  { %v3252_v50 = vmax.f32 %v3991_v62, 0.0  ;;  %v3251_v52 = vmax.f32 %v3960_v28, 0.0  ;;  %v3962_v18 = vadd.f32 %v2951_v19, %v5458_v31  ;;  %v3177_v10 = vpop.f32.mrb[35].mxu1  ;;  %v3993_v38 = vadd.f32 %v3175_v8, %v5455_v39 }
 0x309   :  { %v3336_v57 = vmul.f32 %v5465_v34, %v3250_v15  ;;  %v3253_v46 = vmax.f32 %v3992_v61, 0.0  ;;  %v3254_v58 = vmax.f32 %v3961_v21, 0.0  ;;  %v3994_v13 = vadd.f32 %v3177_v10, %v5461_v24 }
 0x30a   :  { %v3337_v47 = vmul.f32 %v5470_v6, %v3251_v52  ;;  %v3255_v37 = vmax.f32 %v3962_v18, 0.0  ;;  %v3338_v54 = vmul.f32 %v5473_v60, %v3252_v50  ;;  %v3256_v1 = vmax.f32 %v3993_v38, 0.0 }
 0x30b   :  { %v3340_v0 = vmul.f32 %v5465_v34, %v3254_v58  ;;  %v3339_v2 = vmul.f32 %v5478_v40, %v3253_v46  ;;  %v3257_v20 = vmax.f32 %v3994_v13, 0.0 }
 0x30c   :  { %v3400_v45 = vadd.f32 %v3337_v47, %v3336_v57  ;;  %v3341_v12 = vmul.f32 %v5470_v6, %v3255_v37  ;;  %v2955_v26 = vpop.f32.mrb[36].mxu0  ;;  %v3342_v7 = vmul.f32 %v5473_v60, %v3256_v1 }
 0x30d   :  { %v3963_v23 = vadd.f32 %v2955_v26, %v5449_v35  ;;  %v3181_v22 = vpop.f32.mrb[36].mxu1  ;;  %v2957_v48 = vpop.f32.mrb[37].mxu0  ;;  %v3343_v16 = vmul.f32 %v5478_v40, %v3257_v20 }
 0x30e   :  { %v3405_v53 = vadd.f32 %v3341_v12, %v3340_v0  ;;  %v3995_v36 = vadd.f32 %v3181_v22, %v5455_v39  ;;  %v3964_v5 = vadd.f32 %v2957_v48, %v5458_v31  ;;  %v3183_v27 = vpop.f32.mrb[37].mxu1  ;;  %v2959_v41 = vpop.f32.mrb[38].mxu0  ;;  %v3401_v3 = vadd.f32 %v3400_v45, %v3338_v54 }
 0x30f   :  { %v3258_v29 = vmax.f32 %v3963_v23, 0.0  ;;  %v3996_v42 = vadd.f32 %v3183_v27, %v5461_v24  ;;  %v3965_v44 = vadd.f32 %v2959_v41, %v5449_v35  ;;  %v3185_v55 = vpop.f32.mrb[38].mxu1  ;;  %v2961_v25 = vpop.f32.mrb[39].mxu0 }
 0x310   :  { %v3260_v9 = vmax.f32 %v3995_v36, 0.0  ;;  %v3259_v63 = vmax.f32 %v3964_v5, 0.0  ;;  %v3997_v51 = vadd.f32 %v3185_v55, %v5455_v39  ;;  %v3966_v59 = vadd.f32 %v2961_v25, %v5458_v31  ;;  %v3187_v30 = vpop.f32.mrb[39].mxu1 }
 0x311   :  { %v3344_v32 = vmul.f32 %v5465_v34, %v3258_v29  ;;  %v3261_v11 = vmax.f32 %v3996_v42, 0.0  ;;  %v3262_v33 = vmax.f32 %v3965_v44, 0.0  ;;  %v3998_v43 = vadd.f32 %v3187_v30, %v5461_v24 }
 0x312   :  { %v3345_v14 = vmul.f32 %v5470_v6, %v3259_v63  ;;  %v3263_v56 = vmax.f32 %v3966_v59, 0.0  ;;  %v3402_v62 = vadd.f32 %v3401_v3, %v3339_v2  ;;  %v3346_v28 = vmul.f32 %v5473_v60, %v3260_v9 }
 0x313   :  { %v3348_v4 = vmul.f32 %v5465_v34, %v3262_v33  ;;  %v3406_v61 = vadd.f32 %v3405_v53, %v3342_v7  ;;  %v3347_v21 = vmul.f32 %v5478_v40, %v3261_v11  ;;  %v3264_v8 = vmax.f32 %v3997_v51, 0.0 }
 0x314   :  { %v3410_v49 = vadd.f32 %v3345_v14, %v3344_v32  ;;  %v3349_v17 = vmul.f32 %v5470_v6, %v3263_v56  ;;  %v2965_v15 = vpop.f32.mrb[40].mxu0  ;;  %v3265_v19 = vmax.f32 %v3998_v43, 0.0  ;;  %3403 = vadd.xlane.f32.xlu1 %v3402_v62 }
 0x315   :  { %v3967_v50 = vadd.f32 %v2965_v15, %v5449_v35  ;;  %v3191_v52 = vpop.f32.mrb[40].mxu1  ;;  %v2967_v18 = vpop.f32.mrb[41].mxu0  ;;  %v3407_v46 = vadd.f32 %v3406_v61, %v3343_v16  ;;  %v3350_v27 = vmul.f32 %v5473_v60, %v3264_v8 }
 0x316   :  { %v3415_v10 = vadd.f32 %v3349_v17, %v3348_v4  ;;  %v3999_v57 = vadd.f32 %v3191_v52, %v5455_v39  ;;  %v3968_v58 = vadd.f32 %v2967_v18, %v5458_v31  ;;  %v3193_v38 = vpop.f32.mrb[41].mxu1  ;;  %v2969_v47 = vpop.f32.mrb[42].mxu0  ;;  %v3411_v12 = vadd.f32 %v3410_v49, %v3346_v28 }
 0x317   :  { %v3266_v37 = vmax.f32 %v3967_v50, 0.0  ;;  %v4000_v0 = vadd.f32 %v3193_v38, %v5461_v24  ;;  %v3969_v13 = vadd.f32 %v2969_v47, %v5449_v35  ;;  %v3195_v54 = vpop.f32.mrb[42].mxu1  ;;  %v2971_v45 = vpop.f32.mrb[43].mxu0  ;;  %3408 = vadd.xlane.f32.xlu0 %v3407_v46  ;;  %v3351_v20 = vmul.f32 %v5478_v40, %v3265_v19 }
 0x318   :  { %v3268_v26 = vmax.f32 %v3999_v57, 0.0  ;;  %v3267_v2 = vmax.f32 %v3968_v58, 0.0  ;;  %v4001_v1 = vadd.f32 %v3195_v54, %v5455_v39  ;;  %v3970_v23 = vadd.f32 %v2971_v45, %v5458_v31  ;;  %v3197_v22 = vpop.f32.mrb[43].mxu1 }
 0x319   :  { %v3352_v48 = vmul.f32 %v5465_v34, %v3266_v37  ;;  %v3269_v53 = vmax.f32 %v4000_v0, 0.0  ;;  %v3270_v36 = vmax.f32 %v3969_v13, 0.0  ;;  %v4002_v5 = vadd.f32 %v3197_v22, %v5461_v24 }
 0x31a   :  { %v3353_v41 = vmul.f32 %v5470_v6, %v3267_v2  ;;  %v3271_v3 = vmax.f32 %v3970_v23, 0.0  ;;  %v3412_v42 = vadd.f32 %v3411_v12, %v3347_v21  ;;  %v3354_v44 = vmul.f32 %v5473_v60, %v3268_v26 }
 0x31b   :  { %v3356_v29 = vmul.f32 %v5465_v34, %v3270_v36  ;;  %v3416_v63 = vadd.f32 %v3415_v10, %v3350_v27  ;;  %v3355_v51 = vmul.f32 %v5478_v40, %v3269_v53  ;;  %v3272_v59 = vmax.f32 %v4001_v1, 0.0 }
 0x31c   :  { %v3420_v55 = vadd.f32 %v3353_v41, %v3352_v48  ;;  %v3357_v25 = vmul.f32 %v5470_v6, %v3271_v3  ;;  %v2975_v9 = vpop.f32.mrb[44].mxu0  ;;  %v3273_v30 = vmax.f32 %v4002_v5, 0.0  ;;  %3413 = vadd.xlane.f32.xlu0 %v3412_v42 }
 0x31d   :  { %v3971_v32 = vadd.f32 %v2975_v9, %v5449_v35  ;;  %v3201_v11 = vpop.f32.mrb[44].mxu1  ;;  %v2977_v33 = vpop.f32.mrb[45].mxu0  ;;  %v3417_v14 = vadd.f32 %v3416_v63, %v3351_v20  ;;  %v3358_v58 = vmul.f32 %v5473_v60, %v3272_v59 }
 0x31e   :  { %v3425_v43 = vadd.f32 %v3357_v25, %v3356_v29  ;;  %v4003_v7 = vadd.f32 %v3201_v11, %v5455_v39  ;;  %v3972_v56 = vadd.f32 %v2977_v33, %v5458_v31  ;;  %v3203_v16 = vpop.f32.mrb[45].mxu1  ;;  %v2979_v4 = vpop.f32.mrb[46].mxu0  ;;  %v3421_v61 = vadd.f32 %v3420_v55, %v3354_v44 }
 0x31f   :  { %v3274_v62 = vmax.f32 %v3971_v32, 0.0  ;;  %v4004_v28 = vadd.f32 %v3203_v16, %v5461_v24  ;;  %v3973_v49 = vadd.f32 %v2979_v4, %v5449_v35  ;;  %v3205_v17 = vpop.f32.mrb[46].mxu1  ;;  %v2981_v15 = vpop.f32.mrb[47].mxu0  ;;  %3418 = vadd.xlane.f32.xlu1 %v3417_v14  ;;  %v3359_v37 = vmul.f32 %v5478_v40, %v3273_v30 }
 0x320   :  { %v3276_v21 = vmax.f32 %v4003_v7, 0.0  ;;  %v3275_v8 = vmax.f32 %v3972_v56, 0.0  ;;  %v4005_v19 = vadd.f32 %v3205_v17, %v5455_v39  ;;  %v3974_v50 = vadd.f32 %v2981_v15, %v5458_v31  ;;  %v3207_v52 = vpop.f32.mrb[47].mxu1 }
 0x321   :  { %v3360_v18 = vmul.f32 %v5465_v34, %v3274_v62  ;;  %v3277_v10 = vmax.f32 %v4004_v28, 0.0  ;;  %v3278_v57 = vmax.f32 %v3973_v49, 0.0  ;;  %v4006_v46 = vadd.f32 %v3207_v52, %v5461_v24 }
 0x322   :  { %v3361_v38 = vmul.f32 %v5470_v6, %v3275_v8  ;;  %v3279_v47 = vmax.f32 %v3974_v50, 0.0  ;;  %v3422_v13 = vadd.f32 %v3421_v61, %v3355_v51  ;;  %v3362_v54 = vmul.f32 %v5473_v60, %v3276_v21 }
 0x323   :  { %v3364_v0 = vmul.f32 %v5465_v34, %v3278_v57  ;;  %v3426_v2 = vadd.f32 %v3425_v43, %v3358_v58  ;;  %v3363_v1 = vmul.f32 %v5478_v40, %v3277_v10  ;;  %v3280_v23 = vmax.f32 %v4005_v19, 0.0 }
 0x324   :  { %v3430_v45 = vadd.f32 %v3361_v38, %v3360_v18  ;;  %v3365_v12 = vmul.f32 %v5470_v6, %v3279_v47  ;;  %v2985_v26 = vpop.f32.mrb[48].mxu0  ;;  %v3281_v22 = vmax.f32 %v4006_v46, 0.0  ;;  %3423 = vadd.xlane.f32.xlu0 %v3422_v13 }
 0x325   :  { %v3975_v48 = vadd.f32 %v2985_v26, %v5449_v35  ;;  %v3211_v53 = vpop.f32.mrb[48].mxu1  ;;  %v2987_v36 = vpop.f32.mrb[49].mxu0  ;;  %v3427_v41 = vadd.f32 %v3426_v2, %v3359_v37  ;;  %v3366_v56 = vmul.f32 %v5473_v60, %v3280_v23 }
 0x326   :  { %v3435_v5 = vadd.f32 %v3365_v12, %v3364_v0  ;;  %v4007_v27 = vadd.f32 %v3211_v53, %v5455_v39  ;;  %v3976_v3 = vadd.f32 %v2987_v36, %v5458_v31  ;;  %v3213_v20 = vpop.f32.mrb[49].mxu1  ;;  %v2989_v29 = vpop.f32.mrb[50].mxu0  ;;  %v3431_v63 = vadd.f32 %v3430_v45, %v3362_v54 }
 0x327   :  { %v3282_v42 = vmax.f32 %v3975_v48, 0.0  ;;  %v4008_v44 = vadd.f32 %v3213_v20, %v5461_v24  ;;  %v3977_v55 = vadd.f32 %v2989_v29, %v5449_v35  ;;  %v3215_v25 = vpop.f32.mrb[50].mxu1  ;;  %v2991_v9 = vpop.f32.mrb[51].mxu0  ;;  %3428 = vadd.xlane.f32.xlu1 %v3427_v41  ;;  %v3367_v62 = vmul.f32 %v5478_v40, %v3281_v22 }
 0x328   :  { %v3284_v51 = vmax.f32 %v4007_v27, 0.0  ;;  %v3283_v59 = vmax.f32 %v3976_v3, 0.0  ;;  %v4009_v30 = vadd.f32 %v3215_v25, %v5455_v39  ;;  %v3978_v32 = vadd.f32 %v2991_v9, %v5458_v31  ;;  %v3217_v11 = vpop.f32.mrb[51].mxu1 }
 0x329   :  { %v3368_v33 = vmul.f32 %v5465_v34, %v3282_v42  ;;  %v3285_v43 = vmax.f32 %v4008_v44, 0.0  ;;  %v3286_v7 = vmax.f32 %v3977_v55, 0.0  ;;  %v4010_v14 = vadd.f32 %v3217_v11, %v5461_v24 }
 0x32a   :  { %v3369_v16 = vmul.f32 %v5470_v6, %v3283_v59  ;;  %v3287_v4 = vmax.f32 %v3978_v32, 0.0  ;;  %v3432_v49 = vadd.f32 %v3431_v63, %v3363_v1  ;;  %v3370_v17 = vmul.f32 %v5473_v60, %v3284_v51 }
 0x32b   :  { %v3372_v28 = vmul.f32 %v5465_v34, %v3286_v7  ;;  %v3436_v8 = vadd.f32 %v3435_v5, %v3366_v56  ;;  %v3371_v19 = vmul.f32 %v5478_v40, %v3285_v43  ;;  %v3288_v50 = vmax.f32 %v4009_v30, 0.0 }
 0x32c   :  { %v3440_v15 = vadd.f32 %v3369_v16, %v3368_v33  ;;  %v3373_v61 = vmul.f32 %v5470_v6, %v3287_v4  ;;  %v2995_v21 = vpop.f32.mrb[52].mxu0  ;;  %v3289_v52 = vmax.f32 %v4010_v14, 0.0  ;;  %3433 = vadd.xlane.f32.xlu0 %v3432_v49 }
 0x32d   :  { %v3979_v18 = vadd.f32 %v2995_v21, %v5449_v35  ;;  %v3221_v10 = vpop.f32.mrb[52].mxu1  ;;  %v2997_v57 = vpop.f32.mrb[53].mxu0  ;;  %v3437_v38 = vadd.f32 %v3436_v8, %v3367_v62  ;;  %v3374_v3 = vmul.f32 %v5473_v60, %v3288_v50 }
 0x32e   :  { %v3445_v46 = vadd.f32 %v3373_v61, %v3372_v28  ;;  %v4011_v58 = vadd.f32 %v3221_v10, %v5455_v39  ;;  %v3980_v47 = vadd.f32 %v2997_v57, %v5458_v31  ;;  %v3223_v37 = vpop.f32.mrb[53].mxu1  ;;  %v2999_v0 = vpop.f32.mrb[54].mxu0  ;;  %v3441_v2 = vadd.f32 %v3440_v15, %v3370_v17 }
 0x32f   :  { %v3290_v13 = vmax.f32 %v3979_v18, 0.0  ;;  %v4012_v54 = vadd.f32 %v3223_v37, %v5461_v24  ;;  %v3981_v45 = vadd.f32 %v2999_v0, %v5449_v35  ;;  %v3225_v12 = vpop.f32.mrb[54].mxu1  ;;  %v3001_v26 = vpop.f32.mrb[55].mxu0  ;;  %3438 = vadd.xlane.f32.xlu1 %v3437_v38  ;;  %v3375_v42 = vmul.f32 %v5478_v40, %v3289_v52 }
 0x330   :  { %v3292_v1 = vmax.f32 %v4011_v58, 0.0  ;;  %v3291_v23 = vmax.f32 %v3980_v47, 0.0  ;;  %v4013_v22 = vadd.f32 %v3225_v12, %v5455_v39  ;;  %v3982_v48 = vadd.f32 %v3001_v26, %v5458_v31  ;;  %v3227_v53 = vpop.f32.mrb[55].mxu1 }
 0x331   :  { %v3376_v36 = vmul.f32 %v5465_v34, %v3290_v13  ;;  %v3293_v5 = vmax.f32 %v4012_v54, 0.0  ;;  %v3294_v27 = vmax.f32 %v3981_v45, 0.0  ;;  %v4014_v41 = vadd.f32 %v3227_v53, %v5461_v24 }
 0x332   :  { %v3377_v20 = vmul.f32 %v5470_v6, %v3291_v23  ;;  %v3295_v29 = vmax.f32 %v3982_v48, 0.0  ;;  %v3442_v55 = vadd.f32 %v3441_v2, %v3371_v19  ;;  %v3378_v25 = vmul.f32 %v5473_v60, %v3292_v1 }
 0x333   :  { %v3380_v44 = vmul.f32 %v5465_v34, %v3294_v27  ;;  %v3446_v59 = vadd.f32 %v3445_v46, %v3374_v3  ;;  %v3379_v30 = vmul.f32 %v5478_v40, %v3293_v5  ;;  %v3296_v32 = vmax.f32 %v4013_v22, 0.0 }
 0x334   :  { %v3450_v9 = vadd.f32 %v3377_v20, %v3376_v36  ;;  %v3381_v63 = vmul.f32 %v5470_v6, %v3295_v29  ;;  %v3005_v51 = vpop.f32.mrb[56].mxu0  ;;  %v3297_v11 = vmax.f32 %v4014_v41, 0.0  ;;  %3443 = vadd.xlane.f32.xlu0 %v3442_v55 }
 0x335   :  { %v3983_v33 = vadd.f32 %v3005_v51, %v5449_v35  ;;  %v3231_v43 = vpop.f32.mrb[56].mxu1  ;;  %v3007_v7 = vpop.f32.mrb[57].mxu0  ;;  %v3447_v16 = vadd.f32 %v3446_v59, %v3375_v42  ;;  %v3382_v47 = vmul.f32 %v5473_v60, %v3296_v32 }
 0x336   :  { %v3455_v14 = vadd.f32 %v3381_v63, %v3380_v44  ;;  %v4015_v56 = vadd.f32 %v3231_v43, %v5455_v39  ;;  %v3984_v4 = vadd.f32 %v3007_v7, %v5458_v31  ;;  %v3233_v62 = vpop.f32.mrb[57].mxu1  ;;  %v3009_v28 = vpop.f32.mrb[58].mxu0  ;;  %v3451_v8 = vadd.f32 %v3450_v9, %v3378_v25 }
 0x337   :  { %v3298_v49 = vmax.f32 %v3983_v33, 0.0  ;;  %v4016_v17 = vadd.f32 %v3233_v62, %v5461_v24  ;;  %v3985_v15 = vadd.f32 %v3009_v28, %v5449_v35  ;;  %v3235_v61 = vpop.f32.mrb[58].mxu1  ;;  %v3011_v21 = vpop.f32.mrb[59].mxu0  ;;  %3448 = vadd.xlane.f32.xlu1 %v3447_v16  ;;  %v3383_v13 = vmul.f32 %v5478_v40, %v3297_v11 }
 0x338   :  { %v3300_v19 = vmax.f32 %v4015_v56, 0.0  ;;  %v3299_v50 = vmax.f32 %v3984_v4, 0.0  ;;  %v4017_v52 = vadd.f32 %v3235_v61, %v5455_v39  ;;  %v3986_v18 = vadd.f32 %v3011_v21, %v5458_v31  ;;  %v3237_v10 = vpop.f32.mrb[59].mxu1 }
 0x339   :  { %v3384_v57 = vmul.f32 %v5465_v34, %v3298_v49  ;;  %v3301_v46 = vmax.f32 %v4016_v17, 0.0  ;;  %v3302_v58 = vmax.f32 %v3985_v15, 0.0  ;;  %v4018_v38 = vadd.f32 %v3237_v10, %v5461_v24 }
 0x33a   :  { %v3385_v37 = vmul.f32 %v5470_v6, %v3299_v50  ;;  %v3303_v0 = vmax.f32 %v3986_v18, 0.0  ;;  %v3452_v45 = vadd.f32 %v3451_v8, %v3379_v30  ;;  %v3386_v12 = vmul.f32 %v5473_v60, %v3300_v19 }
 0x33b   :  { %v3388_v54 = vmul.f32 %v5465_v34, %v3302_v58  ;;  %v3456_v23 = vadd.f32 %v3455_v14, %v3382_v47  ;;  %v3387_v22 = vmul.f32 %v5478_v40, %v3301_v46  ;;  %v3304_v48 = vmax.f32 %v4017_v52, 0.0  ;;  %v5603_v58 = vld [vmem:[#allocation2] ss:$0 sm:$0xff] }
 0x33c   :  { %v3460_v26 = vadd.f32 %v3385_v37, %v3384_v57  ;;  %v3389_v2 = vmul.f32 %v5470_v6, %v3303_v0  ;;  %v3015_v1 = vpop.f32.mrb[60].mxu0  ;;  %v3305_v53 = vmax.f32 %v4018_v38, 0.0  ;;  %3453 = vadd.xlane.f32.xlu0 %v3452_v45 }
 0x33d   :  { %v3987_v36 = vadd.f32 %v3015_v1, %v5449_v35  ;;  %v3241_v5 = vpop.f32.mrb[60].mxu1  ;;  %v3017_v27 = vpop.f32.mrb[61].mxu0  ;;  %v3457_v20 = vadd.f32 %v3456_v23, %v3383_v13  ;;  %v3390_v4 = vmul.f32 %v5473_v60, %v3304_v48 }
 0x33e   :  { %v3465_v41 = vadd.f32 %v3389_v2, %v3388_v54  ;;  %v4019_v3 = vadd.f32 %v3241_v5, %v5455_v39  ;;  %v3988_v29 = vadd.f32 %v3017_v27, %v5458_v31  ;;  %v3243_v42 = vpop.f32.mrb[61].mxu1  ;;  %v3019_v44 = vpop.f32.mrb[62].mxu0  ;;  %v3461_v59 = vadd.f32 %v3460_v26, %v3386_v12 }
 0x33f   :  { %v3306_v55 = vmax.f32 %v3987_v36, 0.0  ;;  %v4020_v25 = vadd.f32 %v3243_v42, %v5461_v24  ;;  %v3989_v9 = vadd.f32 %v3019_v44, %v5449_v35  ;;  %v3245_v63 = vpop.f32.mrb[62].mxu1  ;;  %v3021_v51 = vpop.f32.mrb[63].mxu0  ;;  %3458 = vadd.xlane.f32.xlu1 %v3457_v20  ;;  %v3391_v49 = vmul.f32 %v5478_v40, %v3305_v53 }
 0x340   :  { %v3308_v30 = vmax.f32 %v4019_v3, 0.0  ;;  %v3307_v32 = vmax.f32 %v3988_v29, 0.0  ;;  %v4021_v11 = vadd.f32 %v3245_v63, %v5455_v39  ;;  %v3990_v33 = vadd.f32 %v3021_v51, %v5458_v31  ;;  %v3247_v43 = vpop.f32.mrb[63].mxu1 }
 0x341   :  { %v3392_v7 = vmul.f32 %v5465_v34, %v3306_v55  ;;  %v3309_v14 = vmax.f32 %v4020_v25, 0.0  ;;  %v3310_v56 = vmax.f32 %v3989_v9, 0.0  ;;  %v4022_v16 = vadd.f32 %v3247_v43, %v5461_v24 }
 0x342   :  { %v3393_v35 = vmul.f32 %v5470_v6, %v3307_v32  ;;  %v3312_v62 = vmax.f32 %v4021_v11, 0.0  ;;  %v3311_v28 = vmax.f32 %v3990_v33, 0.0  ;;  %v3394_v17 = vmul.f32 %v5473_v60, %v3308_v30 }
 0x343   :  { %v3396_v39 = vmul.f32 %v5465_v34, %v3310_v56  ;;  %v3462_v31 = vadd.f32 %v3461_v59, %v3387_v22  ;;  %v3313_v21 = vmax.f32 %v4022_v16, 0.0  ;;  %v3466_v8 = vadd.f32 %v3465_v41, %v3390_v4 }
 0x344   :  { %v3470_v15 = vadd.f32 %v3393_v35, %v3392_v7  ;;  %v3397_v61 = vmul.f32 %v5470_v6, %v3311_v28  ;;  %v3395_v24 = vmul.f32 %v5478_v40, %v3309_v14  ;;  %v3398_v19 = vmul.f32 %v5473_v60, %v3312_v62 }
 0x345   :  { %3463 = vadd.xlane.f32.xlu0 %v3462_v31  ;;  %v3467_v52 = vadd.f32 %v3466_v8, %v3391_v49  ;;  %v3399_v10 = vmul.f32 %v5478_v40, %v3313_v21 }
 0x346   :  { %v3475_v50 = vadd.f32 %v3397_v61, %v3396_v39  ;;  %v3471_v18 = vadd.f32 %v3470_v15, %v3394_v17 }
 0x347   :  { %3468 = vadd.xlane.f32.xlu1 %v3467_v52 }
 0x348   :  { %v3472_v57 = vadd.f32 %v3471_v18, %v3395_v24  ;;  %v3476_v46 = vadd.f32 %v3475_v50, %v3398_v19 }
 0x34a   :  { %3473 = vadd.xlane.f32.xlu0 %v3472_v57  ;;  %v3477_v34 = vadd.f32 %v3476_v46, %v3399_v10 }
 0x34c   :  { %3478 = vadd.xlane.f32.xlu1 %v3477_v34 }
 0x3a1   :  { %v3404_v6 = vpop.xlane.xlu1 %3403 }
 0x3a2   :  { %v3487_v38 = vadd.f32 %v5603_v58, %v3404_v6 }
 0x3a4   :  { %v3879_v47 = vmul.f32 -1.442695, %v3487_v38  ;;  %v3409_v37 = vpop.xlane.xlu0 %3408 }
 0x3a5   :  { %v3488_v60 = vadd.f32 %v5603_v58, %v3409_v37 }
 0x3a6   :  { %4562 = vpow2.f32 %v3879_v47 }
 0x3a7   :  { %v3880_v0 = vmul.f32 -1.442695, %v3488_v60 }
 0x3a9   :  { %4564 = vpow2.f32 %v3880_v0  ;;  %v3414_v13 = vpop.xlane.xlu0 %3413 }
 0x3aa   :  { %v3489_v40 = vadd.f32 %v5603_v58, %v3414_v13 }
 0x3ac   :  { %v3881_v54 = vmul.f32 -1.442695, %v3489_v40  ;;  %v3419_v45 = vpop.xlane.xlu1 %3418 }
 0x3ad   :  { %v3490_v12 = vadd.f32 %v5603_v58, %v3419_v45 }
 0x3ae   :  { %4566 = vpow2.f32 %v3881_v54 }
 0x3af   :  { %v3882_v26 = vmul.f32 -1.442695, %v3490_v12 }
 0x3b0   :  { %v4563_v2 = vpop.eup %4562 }
 0x3b1   :  { %v3551_v1 = vadd.f32 1.0, %v4563_v2  ;;  %4568 = vpow2.f32 %v3882_v26  ;;  %v3424_v23 = vpop.xlane.xlu0 %3423 }
 0x3b2   :  { %v3491_v22 = vadd.f32 %v5603_v58, %v3424_v23 }
 0x3b3   :  { %v4565_v48 = vpop.eup %4564  ;;  %4570 = vrcp.f32 %v3551_v1 }
 0x3b4   :  { %v3552_v53 = vadd.f32 1.0, %v4565_v48  ;;  %v3883_v36 = vmul.f32 -1.442695, %v3491_v22  ;;  %v3429_v5 = vpop.xlane.xlu1 %3428 }
 0x3b5   :  { %v3492_v27 = vadd.f32 %v5603_v58, %v3429_v5 }
 0x3b6   :  { %4572 = vrcp.f32 %v3552_v53 }
 0x3b7   :  { %4574 = vpow2.f32 %v3883_v36  ;;  %v3884_v41 = vmul.f32 -1.442695, %v3492_v27 }
 0x3b8   :  { %v4567_v3 = vpop.eup %4566 }
 0x3b9   :  { %v3553_v20 = vadd.f32 1.0, %v4567_v3  ;;  %4576 = vpow2.f32 %v3884_v41  ;;  %v3434_v29 = vpop.xlane.xlu0 %3433 }
 0x3ba   :  { %v3493_v42 = vadd.f32 %v5603_v58, %v3434_v29 }
 0x3bb   :  { %v4569_v44 = vpop.eup %4568  ;;  %4578 = vrcp.f32 %v3553_v20 }
 0x3bc   :  { %v3554_v55 = vadd.f32 1.0, %v4569_v44  ;;  %v3885_v25 = vmul.f32 -1.442695, %v3493_v42  ;;  %v3439_v9 = vpop.xlane.xlu1 %3438 }
 0x3bd   :  { %v4571_v63 = vpop.eup %4570  ;;  %v3494_v51 = vadd.f32 %v5603_v58, %v3439_v9 }
 0x3be   :  { %3600 = vst.msk [vmem:[%s5694_s9] sm:$0xff] %vm3599_vm0, %v4571_v63  ;;  %4580 = vrcp.f32 %v3554_v55 }
 0x3bf   :  { %4582 = vpow2.f32 %v3885_v25  ;;  %v3886_v59 = vmul.f32 -1.442695, %v3494_v51 }
 0x3c0   :  { %v4573_v30 = vpop.eup %4572 }
 0x3c1   :  { %v4575_v32 = vpop.eup %4574  ;;  %3601 = vst.msk [vmem:[%s5694_s9 + $0x8] sm:$0xff] %vm3599_vm0, %v4573_v30  ;;  %4584 = vpow2.f32 %v3886_v59  ;;  %v3444_v11 = vpop.xlane.xlu0 %3443 }
 0x3c2   :  { %v3555_v33 = vadd.f32 1.0, %v4575_v32  ;;  %v3495_v43 = vadd.f32 %v5603_v58, %v3444_v11 }
 0x3c3   :  { %v4577_v7 = vpop.eup %4576 }
 0x3c4   :  { %4586 = vrcp.f32 %v3555_v33  ;;  %v3556_v14 = vadd.f32 1.0, %v4577_v7  ;;  %v3887_v56 = vmul.f32 -1.442695, %v3495_v43  ;;  %v3449_v16 = vpop.xlane.xlu1 %3448 }
 0x3c5   :  { %v4579_v4 = vpop.eup %4578  ;;  %v3496_v35 = vadd.f32 %v5603_v58, %v3449_v16 }
 0x3c6   :  { %3602 = vst.msk [vmem:[%s5694_s9 + $0x10] sm:$0xff] %vm3599_vm0, %v4579_v4  ;;  %4588 = vrcp.f32 %v3556_v14 }
 0x3c7   :  { %4590 = vpow2.f32 %v3887_v56  ;;  %v3888_v62 = vmul.f32 -1.442695, %v3496_v35 }
 0x3c8   :  { %v4581_v28 = vpop.eup %4580 }
 0x3c9   :  { %v4583_v49 = vpop.eup %4582  ;;  %3603 = vst.msk [vmem:[%s5694_s9 + $0x18] sm:$0xff] %vm3599_vm0, %v4581_v28  ;;  %4592 = vpow2.f32 %v3888_v62  ;;  %v3454_v17 = vpop.xlane.xlu0 %3453 }
 0x3ca   :  { %v3557_v39 = vadd.f32 1.0, %v4583_v49  ;;  %v3497_v31 = vadd.f32 %v5603_v58, %v3454_v17 }
 0x3cb   :  { %v4585_v15 = vpop.eup %4584 }
 0x3cc   :  { %4594 = vrcp.f32 %v3557_v39  ;;  %v3558_v61 = vadd.f32 1.0, %v4585_v15  ;;  %v3889_v21 = vmul.f32 -1.442695, %v3497_v31  ;;  %v3459_v8 = vpop.xlane.xlu1 %3458 }
 0x3cd   :  { %v3498_v24 = vadd.f32 %v5603_v58, %v3459_v8 }
 0x3ce   :  { %v4587_v19 = vpop.eup %4586  ;;  %4596 = vrcp.f32 %v3558_v61 }
 0x3cf   :  { %3604 = vst.msk [vmem:[%s5694_s9 + $0x20] sm:$0xff] %vm3599_vm0, %v4587_v19  ;;  %4598 = vpow2.f32 %v3889_v21  ;;  %v3890_v50 = vmul.f32 -1.442695, %v3498_v24 }
 0x3d0   :  { %v4589_v52 = vpop.eup %4588 }
 0x3d1   :  { %v4591_v18 = vpop.eup %4590  ;;  %3605 = vst.msk [vmem:[%s5694_s9 + $0x28] sm:$0xff] %vm3599_vm0, %v4589_v52  ;;  %4600 = vpow2.f32 %v3890_v50 }
 0x3d2   :  { %v3464_v10 = vpop.xlane.xlu0 %3463  ;;  %v3559_v57 = vadd.f32 1.0, %v4591_v18 }
 0x3d3   :  { %v3499_v46 = vadd.f32 %v5603_v58, %v3464_v10  ;;  %v4593_v34 = vpop.eup %4592 }
 0x3d4   :  { %4602 = vrcp.f32 %v3559_v57  ;;  %v3560_v6 = vadd.f32 1.0, %v4593_v34  ;;  %v3469_v47 = vpop.xlane.xlu1 %3468 }
 0x3d5   :  { %v3891_v38 = vmul.f32 -1.442695, %v3499_v46  ;;  %v3500_v37 = vadd.f32 %v5603_v58, %v3469_v47 }
 0x3d6   :  { %v4595_v60 = vpop.eup %4594  ;;  %4604 = vrcp.f32 %v3560_v6 }
 0x3d7   :  { %v3474_v0 = vpop.xlane.xlu0 %3473  ;;  %3606 = vst.msk [vmem:[%s5694_s9 + $0x30] sm:$0xff] %vm3599_vm0, %v4595_v60  ;;  %4606 = vpow2.f32 %v3891_v38  ;;  %v3892_v13 = vmul.f32 -1.442695, %v3500_v37 }
 0x3d8   :  { %v3501_v40 = vadd.f32 %v5603_v58, %v3474_v0  ;;  %v4597_v54 = vpop.eup %4596 }
 0x3d9   :  { %v3479_v45 = vpop.xlane.xlu1 %3478  ;;  %v4599_v12 = vpop.eup %4598  ;;  %3607 = vst.msk [vmem:[%s5694_s9 + $0x38] sm:$0xff] %vm3599_vm0, %v4597_v54  ;;  %4608 = vpow2.f32 %v3892_v13 }
 0x3da   :  { %v3893_v26 = vmul.f32 -1.442695, %v3501_v40  ;;  %v3502_v2 = vadd.f32 %v5603_v58, %v3479_v45  ;;  %v3561_v1 = vadd.f32 1.0, %v4599_v12 }
 0x3db   :  { %v4601_v23 = vpop.eup %4600 }
 0x3dc   :  { %4610 = vpow2.f32 %v3893_v26  ;;  %v3894_v22 = vmul.f32 -1.442695, %v3502_v2  ;;  %v3562_v48 = vadd.f32 1.0, %v4601_v23 }
 0x3dd   :  { %4612 = vrcp.f32 %v3561_v1 }
 0x3de   :  { %4614 = vpow2.f32 %v3894_v22  ;;  %v4603_v53 = vpop.eup %4602 }
 0x3df   :  { %4616 = vrcp.f32 %v3562_v48  ;;  %3608 = vst.msk [vmem:[%s5694_s9 + $0x40] sm:$0xff] %vm3599_vm0, %v4603_v53 }
 0x3e0   :  { %v4605_v36 = vpop.eup %4604 }
 0x3e1   :  { %v4607_v5 = vpop.eup %4606  ;;  %3609 = vst.msk [vmem:[%s5694_s9 + $0x48] sm:$0xff] %vm3599_vm0, %v4605_v36 }
 0x3e2   :  { %v3563_v58 = vadd.f32 1.0, %v4607_v5 }
 0x3e3   :  { %v4609_v27 = vpop.eup %4608 }
 0x3e4   :  { %4618 = vrcp.f32 %v3563_v58  ;;  %v3564_v41 = vadd.f32 1.0, %v4609_v27 }
 0x3e6   :  { %v4611_v3 = vpop.eup %4610  ;;  %4620 = vrcp.f32 %v3564_v41 }
 0x3e7   :  { %v4613_v20 = vpop.eup %4612  ;;  %v3565_v29 = vadd.f32 1.0, %v4611_v3 }
 0x3e8   :  { %v4615_v42 = vpop.eup %4614  ;;  %3610 = vst.msk [vmem:[%s5694_s9 + $0x50] sm:$0xff] %vm3599_vm0, %v4613_v20 }
 0x3e9   :  { %v4617_v44 = vpop.eup %4616  ;;  %4622 = vrcp.f32 %v3565_v29  ;;  %v3566_v55 = vadd.f32 1.0, %v4615_v42 }
 0x3ea   :  { %3611 = vst.msk [vmem:[%s5694_s9 + $0x58] sm:$0xff] %vm3599_vm0, %v4617_v44 }
 0x3eb   :  { %4624 = vrcp.f32 %v3566_v55 }
 0x3ee   :  { %v4619_v25 = vpop.eup %4618 }
 0x3ef   :  { %3612 = vst.msk [vmem:[%s5694_s9 + $0x60] sm:$0xff] %vm3599_vm0, %v4619_v25 }
 0x3f0   :  { %v4621_v9 = vpop.eup %4620 }
 0x3f1   :  { %3613 = vst.msk [vmem:[%s5694_s9 + $0x68] sm:$0xff] %vm3599_vm0, %v4621_v9 }
 0x3f3   :  { %v4623_v63 = vpop.eup %4622 }
 0x3f4   :  { %3614 = vst.msk [vmem:[%s5694_s9 + $0x70] sm:$0xff] %vm3599_vm0, %v4623_v63 }
 0x3f5   :  { %v4625_v51 = vpop.eup %4624 }
 0x3f6   :  { %3615 = vst.msk [vmem:[%s5694_s9 + $0x78] sm:$0xff] %vm3599_vm0, %v4625_v51 }
 0x3f7   :  { %3620 = vsyncpa [#allocation4], 1 }
 0x3f8   :  { %3621 = vsyncpa [#allocation6], 1 }

</bundles_post_ra>
